<compile_context>
chip_gen: v5e
topology: v5e:2x2
jax: 0.10.0
libtpu: 0.0.40
codegen_flags: <defaults>
</compile_context>

<pallas_src>
import functools

import jax
import jax.numpy as jnp
from jax.experimental import pallas as pl
from jax.experimental.pallas import tpu as pltpu


# ------------------------------ Pallas kernel -------------------------------

def _seq2seq_kernel(enc_x_ref, dec_x_ref,
                    ewih_ref, ewhh_ref, eb_ref,
                    dwih_ref, dwhh_ref, db_ref,
                    lw_ref, lb_ref,
                    out_ref,
                    h_scr,
                    *, hidden, seq_len, target_len, batch):
    H, S, T, B = hidden, seq_len, target_len, batch

    # ---- hoisted input projections: one batched MXU matmul per weight set ----
    # enc_x_ref: (S*B, D) time-major, dec_x_ref: (T*B, D) time-major teacher-forced inputs.
    enc_gx = jnp.dot(enc_x_ref[...], ewih_ref[...],
                     preferred_element_type=jnp.float32) + eb_ref[...]   # (S*B, 4H) f32
    dec_gx = jnp.dot(dec_x_ref[...], dwih_ref[...],
                     preferred_element_type=jnp.float32) + db_ref[...]   # (T*B, 4H) f32

    ewhh = ewhh_ref[...]          # (H, 4H) bf16
    dwhh = dwhh_ref[...]          # (H, 4H) bf16

    def cell(gx, h, c, whh):
        # gx already contains x @ W_ih + (b_ih + b_hh); gate order is (i, f, o, g).
        gates = gx + jnp.dot(h.astype(whh.dtype), whh,
                             preferred_element_type=jnp.float32)
        sig = jax.nn.sigmoid(gates[:, :3 * H])    # i, f, o in one EUP region
        i = sig[:, 0:H]
        f = sig[:, H:2 * H]
        o = sig[:, 2 * H:3 * H]
        g = jnp.tanh(gates[:, 3 * H:])
        c_new = f * c + i * g
        h_new = o * jnp.tanh(c_new)
        return h_new, c_new

    h = jnp.zeros((B, H), jnp.float32)
    c = jnp.zeros((B, H), jnp.float32)

    # ---------------- encoder: fully unrolled (static trip count) ----------------
    for t in range(S):
        h, c = cell(enc_gx[t * B:(t + 1) * B, :], h, c, ewhh)

    # ---------------- decoder: fully unrolled; only stash h per step ----------------
    for t in range(T):
        h, c = cell(dec_gx[t * B:(t + 1) * B, :], h, c, dwhh)
        h_scr[t * B:(t + 1) * B, :] = h

    # ---- hoisted linear head: one (T*B, H) x (H, D) matmul + single store ----
    y = jnp.dot(h_scr[...].astype(lw_ref.dtype), lw_ref[...],
                preferred_element_type=jnp.float32) + lb_ref[...]        # (T*B, D)
    out_ref[...] = y.astype(out_ref.dtype)


# ------------------------------ wrapper ------------------------------

def _prep_lstm_params(w_ih, w_hh, b_ih, b_hh, H, compute_dtype):
    """Reorder PyTorch gate order (i, f, g, o) -> (i, f, o, g), transpose, fold biases."""
    def ro(a):
        return jnp.concatenate([a[:2 * H], a[3 * H:], a[2 * H:3 * H]], axis=0)
    wih_t = ro(w_ih).T.astype(compute_dtype)                     # (in, 4H)
    whh_t = ro(w_hh).T.astype(compute_dtype)                     # (H, 4H)
    b = ro(b_ih + b_hh).reshape(1, 4 * H).astype(jnp.float32)    # (1, 4H)
    return wih_t, whh_t, b


def lstm_seq2seq_forward(x, params, target_len, compute_dtype=jnp.bfloat16):
    """x: (B, S, D) float32.  Returns (B, target_len, D) float32."""
    B, S, D = x.shape
    H = params["enc_w_hh"].shape[1]
    T = int(target_len)

    ewih_t, ewhh_t, eb = _prep_lstm_params(params["enc_w_ih"], params["enc_w_hh"],
                                           params["enc_b_ih"], params["enc_b_hh"],
                                           H, compute_dtype)
    dwih_t, dwhh_t, db = _prep_lstm_params(params["dec_w_ih"], params["dec_w_hh"],
                                           params["dec_b_ih"], params["dec_b_hh"],
                                           H, compute_dtype)
    lw_t = params["lin_w"].T.astype(compute_dtype)               # (H, D)
    lb = params["lin_b"].reshape(1, D).astype(jnp.float32)       # (1, D)

    # time-major encoder inputs, flattened to (S*B, D)
    enc_x = jnp.transpose(x, (1, 0, 2)).reshape(S * B, D).astype(compute_dtype)

    # Teacher-forced decoder inputs, gathered up front (time-major, flattened to (T*B, D)).
    # Step 0 uses x[:, S-1]; step t>=1 uses x[:, S-t]. `% S` matches PyTorch's
    # negative-index wrap if target_len > S.
    dec_idx = []
    cur = S - 1
    for t in range(T):
        dec_idx.append(cur)
        cur = (S - t - 1) % S
    dec_x = (jnp.transpose(x[:, jnp.array(dec_idx), :], (1, 0, 2))
             .reshape(T * B, D).astype(compute_dtype))

    kernel = functools.partial(_seq2seq_kernel, hidden=H, seq_len=S,
                               target_len=T, batch=B)
    vmem = pl.BlockSpec(memory_space=pltpu.MemorySpace.VMEM)

    flops = int(2 * ((S + T) * B * 4 * H * (D + H) + T * B * H * D))
    transcendentals = int((S + T) * B * 5 * H)
    bytes_accessed = int((S * B * D + T * B * D) * 2
                         + 2 * (D * 4 * H + H * 4 * H) * 2 + H * D * 2
                         + (2 * 4 * H + D) * 4
                         + T * B * D * 4)

    out_tm = pl.pallas_call(
        kernel,
        out_shape=jax.ShapeDtypeStruct((T * B, D), jnp.float32),
        in_specs=[vmem] * 10,
        out_specs=vmem,
        scratch_shapes=[pltpu.VMEM((T * B, H), jnp.float32)],
        cost_estimate=pl.CostEstimate(flops=flops,
                                      transcendentals=transcendentals,
                                      bytes_accessed=bytes_accessed),
    )(enc_x, dec_x, ewih_t, ewhh_t, eb, dwih_t, dwhh_t, db, lw_t, lb)

    # kernel output is time-major (T, B, D) flattened -> back to (B, T, D)
    return jnp.transpose(out_tm.reshape(T, B, D), (1, 0, 2))


# ------------------------------ pure-JAX reference ------------------------------

def _ref_lstm_step(x_t, h, c, w_ih, w_hh, b_ih, b_hh, H):
    gates = x_t @ w_ih.T + b_ih + h @ w_hh.T + b_hh
    i = jax.nn.sigmoid(gates[:, 0:H])
    f = jax.nn.sigmoid(gates[:, H:2 * H])
    g = jnp.tanh(gates[:, 2 * H:3 * H])
    o = jax.nn.sigmoid(gates[:, 3 * H:4 * H])
    c_new = f * c + i * g
    return o * jnp.tanh(c_new), c_new


def ref_forward(x, p, target_len):
    B, S, D = x.shape
    H = p["enc_w_hh"].shape[1]
    h = jnp.zeros((B, H), jnp.float32)
    c = jnp.zeros((B, H), jnp.float32)
    for t in range(S):
        h, c = _ref_lstm_step(x[:, t, :], h, c, p["enc_w_ih"], p["enc_w_hh"],
                              p["enc_b_ih"], p["enc_b_hh"], H)
    outs = []
    dec_in = x[:, S - 1, :]
    for t in range(target_len):
        h, c = _ref_lstm_step(dec_in, h, c, p["dec_w_ih"], p["dec_w_hh"],
                              p["dec_b_ih"], p["dec_b_hh"], H)
        y = h @ p["lin_w"].T + p["lin_b"]
        outs.append(y)
        dec_in = x[:, S - t - 1, :]
    return jnp.stack(outs, axis=1)


# ------------------------------ main ------------------------------

def init_params(key, input_size, hidden_size):
    k = 1.0 / jnp.sqrt(hidden_size)
    keys = jax.random.split(key, 10)
    u = lambda kk, shape: jax.random.uniform(kk, shape, jnp.float32, -k, k)
    return {
        "enc_w_ih": u(keys[0], (4 * hidden_size, input_size)),
        "enc_w_hh": u(keys[1], (4 * hidden_size, hidden_size)),
        "enc_b_ih": u(keys[2], (4 * hidden_size,)),
        "enc_b_hh": u(keys[3], (4 * hidden_size,)),
        "dec_w_ih": u(keys[4], (4 * hidden_size, input_size)),
        "dec_w_hh": u(keys[5], (4 * hidden_size, hidden_size)),
        "dec_b_ih": u(keys[6], (4 * hidden_size,)),
        "dec_b_hh": u(keys[7], (4 * hidden_size,)),
        "lin_w": u(keys[8], (input_size, hidden_size)),
        "lin_b": u(keys[9], (input_size,)),
    }


if __name__ == "__main__":
    B, S, D, H = 2, 8, 4, 32
    target_len = 6

    key = jax.random.PRNGKey(0)
    kx, kp = jax.random.split(key)
    x = jax.random.normal(kx, (B, S, D), jnp.float32)
    params = init_params(kp, D, H)

    out = lstm_seq2seq_forward(x, params, target_len)
    out = jax.block_until_ready(out)

    ref = ref_forward(x, params, target_len)
    assert out.shape == (B, target_len, D)
    # bf16 matmul inputs (f32 accumulation / gate math) over S + target_len recurrent
    # steps -> loosened tolerance vs the pure-f32 reference.
    assert jnp.allclose(out, ref, atol=5e-2, rtol=5e-2), (
        f"max abs err {jnp.max(jnp.abs(out - ref))}")

    print("KERNEL_OK")
</pallas_src>

<mosaic_0001>
module attributes {stable_mosaic.version = 11 : i64} {
  func.func @_seq2seq_kernel(%arg0: memref<16x4xbf16, #tpu.memory_space<vmem>>, %arg1: memref<12x4xbf16, #tpu.memory_space<vmem>>, %arg2: memref<4x128xbf16, #tpu.memory_space<vmem>>, %arg3: memref<32x128xbf16, #tpu.memory_space<vmem>>, %arg4: memref<1x128xf32, #tpu.memory_space<vmem>>, %arg5: memref<4x128xbf16, #tpu.memory_space<vmem>>, %arg6: memref<32x128xbf16, #tpu.memory_space<vmem>>, %arg7: memref<1x128xf32, #tpu.memory_space<vmem>>, %arg8: memref<32x4xbf16, #tpu.memory_space<vmem>>, %arg9: memref<1x4xf32, #tpu.memory_space<vmem>>, %arg10: memref<12x4xf32, #tpu.memory_space<vmem>>, %arg11: memref<12x32xf32, #tpu.memory_space<vmem>>) attributes {dimension_semantics = [], scalar_prefetch = 0 : i64, scratch_operands = 1 : i64, tpu.core_type = #tpu.core_type<tc>} {
    %c0 = arith.constant 0 : index
    %c0_0 = arith.constant 0 : index
    %0 = vector.load %arg0[%c0, %c0_0] : memref<16x4xbf16, #tpu.memory_space<vmem>>, vector<16x4xbf16>
    %c0_1 = arith.constant 0 : index
    %c0_2 = arith.constant 0 : index
    %1 = vector.load %arg2[%c0_1, %c0_2] : memref<4x128xbf16, #tpu.memory_space<vmem>>, vector<4x128xbf16>
    %cst = arith.constant dense<0.000000e+00> : vector<16x128xf32>
    %2 = tpu.matmul %0, %1, %cst {dimension_numbers = #tpu.dot_dimension_numbers<[1], [0], [0], [1], [0, 0, 1, 1], [], []>} : vector<16x4xbf16>, vector<4x128xbf16>, vector<16x128xf32> -> vector<16x128xf32>
    %c0_3 = arith.constant 0 : index
    %c0_4 = arith.constant 0 : index
    %3 = vector.load %arg4[%c0_3, %c0_4] : memref<1x128xf32, #tpu.memory_space<vmem>>, vector<1x128xf32>
    %4 = vector.broadcast %3 : vector<1x128xf32> to vector<16x128xf32>
    %5 = arith.addf %2, %4 : vector<16x128xf32>
    %c0_5 = arith.constant 0 : index
    %c0_6 = arith.constant 0 : index
    %6 = vector.load %arg1[%c0_5, %c0_6] : memref<12x4xbf16, #tpu.memory_space<vmem>>, vector<12x4xbf16>
    %c0_7 = arith.constant 0 : index
    %c0_8 = arith.constant 0 : index
    %7 = vector.load %arg5[%c0_7, %c0_8] : memref<4x128xbf16, #tpu.memory_space<vmem>>, vector<4x128xbf16>
    %cst_9 = arith.constant dense<0.000000e+00> : vector<12x128xf32>
    %8 = tpu.matmul %6, %7, %cst_9 {dimension_numbers = #tpu.dot_dimension_numbers<[1], [0], [0], [1], [0, 0, 1, 1], [], []>} : vector<12x4xbf16>, vector<4x128xbf16>, vector<12x128xf32> -> vector<12x128xf32>
    %c0_10 = arith.constant 0 : index
    %c0_11 = arith.constant 0 : index
    %9 = vector.load %arg7[%c0_10, %c0_11] : memref<1x128xf32, #tpu.memory_space<vmem>>, vector<1x128xf32>
    %10 = vector.broadcast %9 : vector<1x128xf32> to vector<12x128xf32>
    %11 = arith.addf %8, %10 : vector<12x128xf32>
    %c0_12 = arith.constant 0 : index
    %c0_13 = arith.constant 0 : index
    %12 = vector.load %arg3[%c0_12, %c0_13] : memref<32x128xbf16, #tpu.memory_space<vmem>>, vector<32x128xbf16>
    %c0_14 = arith.constant 0 : index
    %c0_15 = arith.constant 0 : index
    %13 = vector.load %arg6[%c0_14, %c0_15] : memref<32x128xbf16, #tpu.memory_space<vmem>>, vector<32x128xbf16>
    %cst_16 = arith.constant 0.000000e+00 : f32
    %14 = vector.broadcast %cst_16 : f32 to vector<2x32xf32>
    %cst_17 = arith.constant 0.000000e+00 : f32
    %15 = vector.broadcast %cst_17 : f32 to vector<2x32xf32>
    %16 = vector.extract_strided_slice %5 {offsets = [0, 0], sizes = [2, 128], strides = [1, 1]} : vector<16x128xf32> to vector<2x128xf32>
    %17 = arith.truncf %14 : vector<2x32xf32> to vector<2x32xbf16>
    %cst_18 = arith.constant dense<0.000000e+00> : vector<2x128xf32>
    %18 = tpu.matmul %17, %12, %cst_18 {dimension_numbers = #tpu.dot_dimension_numbers<[1], [0], [0], [1], [0, 0, 1, 1], [], []>} : vector<2x32xbf16>, vector<32x128xbf16>, vector<2x128xf32> -> vector<2x128xf32>
    %19 = arith.addf %16, %18 : vector<2x128xf32>
    %20 = vector.extract_strided_slice %19 {offsets = [0, 0], sizes = [2, 96], strides = [1, 1]} : vector<2x128xf32> to vector<2x96xf32>
    %21 = arith.negf %20 : vector<2x96xf32>
    %22 = math.exp %21 : vector<2x96xf32>
    %cst_19 = arith.constant 1.000000e+00 : f32
    %23 = vector.broadcast %cst_19 : f32 to vector<2x96xf32>
    %24 = arith.addf %23, %22 : vector<2x96xf32>
    %25 = arith.divf %23, %24 : vector<2x96xf32>
    %26 = vector.extract_strided_slice %25 {offsets = [0, 0], sizes = [2, 32], strides = [1, 1]} : vector<2x96xf32> to vector<2x32xf32>
    %27 = vector.extract_strided_slice %25 {offsets = [0, 32], sizes = [2, 32], strides = [1, 1]} : vector<2x96xf32> to vector<2x32xf32>
    %28 = vector.extract_strided_slice %25 {offsets = [0, 64], sizes = [2, 32], strides = [1, 1]} : vector<2x96xf32> to vector<2x32xf32>
    %29 = vector.extract_strided_slice %19 {offsets = [0, 96], sizes = [2, 32], strides = [1, 1]} : vector<2x128xf32> to vector<2x32xf32>
    %30 = math.tanh %29 : vector<2x32xf32>
    %31 = arith.mulf %27, %15 : vector<2x32xf32>
    %32 = arith.mulf %26, %30 : vector<2x32xf32>
    %33 = arith.addf %31, %32 : vector<2x32xf32>
    %34 = math.tanh %33 : vector<2x32xf32>
    %35 = arith.mulf %28, %34 : vector<2x32xf32>
    %36 = vector.extract_strided_slice %5 {offsets = [2, 0], sizes = [2, 128], strides = [1, 1]} : vector<16x128xf32> to vector<2x128xf32>
    %37 = arith.truncf %35 : vector<2x32xf32> to vector<2x32xbf16>
    %cst_20 = arith.constant dense<0.000000e+00> : vector<2x128xf32>
    %38 = tpu.matmul %37, %12, %cst_20 {dimension_numbers = #tpu.dot_dimension_numbers<[1], [0], [0], [1], [0, 0, 1, 1], [], []>} : vector<2x32xbf16>, vector<32x128xbf16>, vector<2x128xf32> -> vector<2x128xf32>
    %39 = arith.addf %36, %38 : vector<2x128xf32>
    %40 = vector.extract_strided_slice %39 {offsets = [0, 0], sizes = [2, 96], strides = [1, 1]} : vector<2x128xf32> to vector<2x96xf32>
    %41 = arith.negf %40 : vector<2x96xf32>
    %42 = math.exp %41 : vector<2x96xf32>
    %cst_21 = arith.constant 1.000000e+00 : f32
    %43 = vector.broadcast %cst_21 : f32 to vector<2x96xf32>
    %44 = arith.addf %43, %42 : vector<2x96xf32>
    %45 = arith.divf %43, %44 : vector<2x96xf32>
    %46 = vector.extract_strided_slice %45 {offsets = [0, 0], sizes = [2, 32], strides = [1, 1]} : vector<2x96xf32> to vector<2x32xf32>
    %47 = vector.extract_strided_slice %45 {offsets = [0, 32], sizes = [2, 32], strides = [1, 1]} : vector<2x96xf32> to vector<2x32xf32>
    %48 = vector.extract_strided_slice %45 {offsets = [0, 64], sizes = [2, 32], strides = [1, 1]} : vector<2x96xf32> to vector<2x32xf32>
    %49 = vector.extract_strided_slice %39 {offsets = [0, 96], sizes = [2, 32], strides = [1, 1]} : vector<2x128xf32> to vector<2x32xf32>
    %50 = math.tanh %49 : vector<2x32xf32>
    %51 = arith.mulf %47, %33 : vector<2x32xf32>
    %52 = arith.mulf %46, %50 : vector<2x32xf32>
    %53 = arith.addf %51, %52 : vector<2x32xf32>
    %54 = math.tanh %53 : vector<2x32xf32>
    %55 = arith.mulf %48, %54 : vector<2x32xf32>
    %56 = vector.extract_strided_slice %5 {offsets = [4, 0], sizes = [2, 128], strides = [1, 1]} : vector<16x128xf32> to vector<2x128xf32>
    %57 = arith.truncf %55 : vector<2x32xf32> to vector<2x32xbf16>
    %cst_22 = arith.constant dense<0.000000e+00> : vector<2x128xf32>
    %58 = tpu.matmul %57, %12, %cst_22 {dimension_numbers = #tpu.dot_dimension_numbers<[1], [0], [0], [1], [0, 0, 1, 1], [], []>} : vector<2x32xbf16>, vector<32x128xbf16>, vector<2x128xf32> -> vector<2x128xf32>
    %59 = arith.addf %56, %58 : vector<2x128xf32>
    %60 = vector.extract_strided_slice %59 {offsets = [0, 0], sizes = [2, 96], strides = [1, 1]} : vector<2x128xf32> to vector<2x96xf32>
    %61 = arith.negf %60 : vector<2x96xf32>
    %62 = math.exp %61 : vector<2x96xf32>
    %cst_23 = arith.constant 1.000000e+00 : f32
    %63 = vector.broadcast %cst_23 : f32 to vector<2x96xf32>
    %64 = arith.addf %63, %62 : vector<2x96xf32>
    %65 = arith.divf %63, %64 : vector<2x96xf32>
    %66 = vector.extract_strided_slice %65 {offsets = [0, 0], sizes = [2, 32], strides = [1, 1]} : vector<2x96xf32> to vector<2x32xf32>
    %67 = vector.extract_strided_slice %65 {offsets = [0, 32], sizes = [2, 32], strides = [1, 1]} : vector<2x96xf32> to vector<2x32xf32>
    %68 = vector.extract_strided_slice %65 {offsets = [0, 64], sizes = [2, 32], strides = [1, 1]} : vector<2x96xf32> to vector<2x32xf32>
    %69 = vector.extract_strided_slice %59 {offsets = [0, 96], sizes = [2, 32], strides = [1, 1]} : vector<2x128xf32> to vector<2x32xf32>
    %70 = math.tanh %69 : vector<2x32xf32>
    %71 = arith.mulf %67, %53 : vector<2x32xf32>
    %72 = arith.mulf %66, %70 : vector<2x32xf32>
    %73 = arith.addf %71, %72 : vector<2x32xf32>
    %74 = math.tanh %73 : vector<2x32xf32>
    %75 = arith.mulf %68, %74 : vector<2x32xf32>
    %76 = vector.extract_strided_slice %5 {offsets = [6, 0], sizes = [2, 128], strides = [1, 1]} : vector<16x128xf32> to vector<2x128xf32>
    %77 = arith.truncf %75 : vector<2x32xf32> to vector<2x32xbf16>
    %cst_24 = arith.constant dense<0.000000e+00> : vector<2x128xf32>
    %78 = tpu.matmul %77, %12, %cst_24 {dimension_numbers = #tpu.dot_dimension_numbers<[1], [0], [0], [1], [0, 0, 1, 1], [], []>} : vector<2x32xbf16>, vector<32x128xbf16>, vector<2x128xf32> -> vector<2x128xf32>
    %79 = arith.addf %76, %78 : vector<2x128xf32>
    %80 = vector.extract_strided_slice %79 {offsets = [0, 0], sizes = [2, 96], strides = [1, 1]} : vector<2x128xf32> to vector<2x96xf32>
    %81 = arith.negf %80 : vector<2x96xf32>
    %82 = math.exp %81 : vector<2x96xf32>
    %cst_25 = arith.constant 1.000000e+00 : f32
    %83 = vector.broadcast %cst_25 : f32 to vector<2x96xf32>
    %84 = arith.addf %83, %82 : vector<2x96xf32>
    %85 = arith.divf %83, %84 : vector<2x96xf32>
    %86 = vector.extract_strided_slice %85 {offsets = [0, 0], sizes = [2, 32], strides = [1, 1]} : vector<2x96xf32> to vector<2x32xf32>
    %87 = vector.extract_strided_slice %85 {offsets = [0, 32], sizes = [2, 32], strides = [1, 1]} : vector<2x96xf32> to vector<2x32xf32>
    %88 = vector.extract_strided_slice %85 {offsets = [0, 64], sizes = [2, 32], strides = [1, 1]} : vector<2x96xf32> to vector<2x32xf32>
    %89 = vector.extract_strided_slice %79 {offsets = [0, 96], sizes = [2, 32], strides = [1, 1]} : vector<2x128xf32> to vector<2x32xf32>
    %90 = math.tanh %89 : vector<2x32xf32>
    %91 = arith.mulf %87, %73 : vector<2x32xf32>
    %92 = arith.mulf %86, %90 : vector<2x32xf32>
    %93 = arith.addf %91, %92 : vector<2x32xf32>
    %94 = math.tanh %93 : vector<2x32xf32>
    %95 = arith.mulf %88, %94 : vector<2x32xf32>
    %96 = vector.extract_strided_slice %5 {offsets = [8, 0], sizes = [2, 128], strides = [1, 1]} : vector<16x128xf32> to vector<2x128xf32>
    %97 = arith.truncf %95 : vector<2x32xf32> to vector<2x32xbf16>
    %cst_26 = arith.constant dense<0.000000e+00> : vector<2x128xf32>
    %98 = tpu.matmul %97, %12, %cst_26 {dimension_numbers = #tpu.dot_dimension_numbers<[1], [0], [0], [1], [0, 0, 1, 1], [], []>} : vector<2x32xbf16>, vector<32x128xbf16>, vector<2x128xf32> -> vector<2x128xf32>
    %99 = arith.addf %96, %98 : vector<2x128xf32>
    %100 = vector.extract_strided_slice %99 {offsets = [0, 0], sizes = [2, 96], strides = [1, 1]} : vector<2x128xf32> to vector<2x96xf32>
    %101 = arith.negf %100 : vector<2x96xf32>
    %102 = math.exp %101 : vector<2x96xf32>
    %cst_27 = arith.constant 1.000000e+00 : f32
    %103 = vector.broadcast %cst_27 : f32 to vector<2x96xf32>
    %104 = arith.addf %103, %102 : vector<2x96xf32>
    %105 = arith.divf %103, %104 : vector<2x96xf32>
    %106 = vector.extract_strided_slice %105 {offsets = [0, 0], sizes = [2, 32], strides = [1, 1]} : vector<2x96xf32> to vector<2x32xf32>
    %107 = vector.extract_strided_slice %105 {offsets = [0, 32], sizes = [2, 32], strides = [1, 1]} : vector<2x96xf32> to vector<2x32xf32>
    %108 = vector.extract_strided_slice %105 {offsets = [0, 64], sizes = [2, 32], strides = [1, 1]} : vector<2x96xf32> to vector<2x32xf32>
    %109 = vector.extract_strided_slice %99 {offsets = [0, 96], sizes = [2, 32], strides = [1, 1]} : vector<2x128xf32> to vector<2x32xf32>
    %110 = math.tanh %109 : vector<2x32xf32>
    %111 = arith.mulf %107, %93 : vector<2x32xf32>
    %112 = arith.mulf %106, %110 : vector<2x32xf32>
    %113 = arith.addf %111, %112 : vector<2x32xf32>
    %114 = math.tanh %113 : vector<2x32xf32>
    %115 = arith.mulf %108, %114 : vector<2x32xf32>
    %116 = vector.extract_strided_slice %5 {offsets = [10, 0], sizes = [2, 128], strides = [1, 1]} : vector<16x128xf32> to vector<2x128xf32>
    %117 = arith.truncf %115 : vector<2x32xf32> to vector<2x32xbf16>
    %cst_28 = arith.constant dense<0.000000e+00> : vector<2x128xf32>
    %118 = tpu.matmul %117, %12, %cst_28 {dimension_numbers = #tpu.dot_dimension_numbers<[1], [0], [0], [1], [0, 0, 1, 1], [], []>} : vector<2x32xbf16>, vector<32x128xbf16>, vector<2x128xf32> -> vector<2x128xf32>
    %119 = arith.addf %116, %118 : vector<2x128xf32>
    %120 = vector.extract_strided_slice %119 {offsets = [0, 0], sizes = [2, 96], strides = [1, 1]} : vector<2x128xf32> to vector<2x96xf32>
    %121 = arith.negf %120 : vector<2x96xf32>
    %122 = math.exp %121 : vector<2x96xf32>
    %cst_29 = arith.constant 1.000000e+00 : f32
    %123 = vector.broadcast %cst_29 : f32 to vector<2x96xf32>
    %124 = arith.addf %123, %122 : vector<2x96xf32>
    %125 = arith.divf %123, %124 : vector<2x96xf32>
    %126 = vector.extract_strided_slice %125 {offsets = [0, 0], sizes = [2, 32], strides = [1, 1]} : vector<2x96xf32> to vector<2x32xf32>
    %127 = vector.extract_strided_slice %125 {offsets = [0, 32], sizes = [2, 32], strides = [1, 1]} : vector<2x96xf32> to vector<2x32xf32>
    %128 = vector.extract_strided_slice %125 {offsets = [0, 64], sizes = [2, 32], strides = [1, 1]} : vector<2x96xf32> to vector<2x32xf32>
    %129 = vector.extract_strided_slice %119 {offsets = [0, 96], sizes = [2, 32], strides = [1, 1]} : vector<2x128xf32> to vector<2x32xf32>
    %130 = math.tanh %129 : vector<2x32xf32>
    %131 = arith.mulf %127, %113 : vector<2x32xf32>
    %132 = arith.mulf %126, %130 : vector<2x32xf32>
    %133 = arith.addf %131, %132 : vector<2x32xf32>
    %134 = math.tanh %133 : vector<2x32xf32>
    %135 = arith.mulf %128, %134 : vector<2x32xf32>
    %136 = vector.extract_strided_slice %5 {offsets = [12, 0], sizes = [2, 128], strides = [1, 1]} : vector<16x128xf32> to vector<2x128xf32>
    %137 = arith.truncf %135 : vector<2x32xf32> to vector<2x32xbf16>
    %cst_30 = arith.constant dense<0.000000e+00> : vector<2x128xf32>
    %138 = tpu.matmul %137, %12, %cst_30 {dimension_numbers = #tpu.dot_dimension_numbers<[1], [0], [0], [1], [0, 0, 1, 1], [], []>} : vector<2x32xbf16>, vector<32x128xbf16>, vector<2x128xf32> -> vector<2x128xf32>
    %139 = arith.addf %136, %138 : vector<2x128xf32>
    %140 = vector.extract_strided_slice %139 {offsets = [0, 0], sizes = [2, 96], strides = [1, 1]} : vector<2x128xf32> to vector<2x96xf32>
    %141 = arith.negf %140 : vector<2x96xf32>
    %142 = math.exp %141 : vector<2x96xf32>
    %cst_31 = arith.constant 1.000000e+00 : f32
    %143 = vector.broadcast %cst_31 : f32 to vector<2x96xf32>
    %144 = arith.addf %143, %142 : vector<2x96xf32>
    %145 = arith.divf %143, %144 : vector<2x96xf32>
    %146 = vector.extract_strided_slice %145 {offsets = [0, 0], sizes = [2, 32], strides = [1, 1]} : vector<2x96xf32> to vector<2x32xf32>
    %147 = vector.extract_strided_slice %145 {offsets = [0, 32], sizes = [2, 32], strides = [1, 1]} : vector<2x96xf32> to vector<2x32xf32>
    %148 = vector.extract_strided_slice %145 {offsets = [0, 64], sizes = [2, 32], strides = [1, 1]} : vector<2x96xf32> to vector<2x32xf32>
    %149 = vector.extract_strided_slice %139 {offsets = [0, 96], sizes = [2, 32], strides = [1, 1]} : vector<2x128xf32> to vector<2x32xf32>
    %150 = math.tanh %149 : vector<2x32xf32>
    %151 = arith.mulf %147, %133 : vector<2x32xf32>
    %152 = arith.mulf %146, %150 : vector<2x32xf32>
    %153 = arith.addf %151, %152 : vector<2x32xf32>
    %154 = math.tanh %153 : vector<2x32xf32>
    %155 = arith.mulf %148, %154 : vector<2x32xf32>
    %156 = vector.extract_strided_slice %5 {offsets = [14, 0], sizes = [2, 128], strides = [1, 1]} : vector<16x128xf32> to vector<2x128xf32>
    %157 = arith.truncf %155 : vector<2x32xf32> to vector<2x32xbf16>
    %cst_32 = arith.constant dense<0.000000e+00> : vector<2x128xf32>
    %158 = tpu.matmul %157, %12, %cst_32 {dimension_numbers = #tpu.dot_dimension_numbers<[1], [0], [0], [1], [0, 0, 1, 1], [], []>} : vector<2x32xbf16>, vector<32x128xbf16>, vector<2x128xf32> -> vector<2x128xf32>
    %159 = arith.addf %156, %158 : vector<2x128xf32>
    %160 = vector.extract_strided_slice %159 {offsets = [0, 0], sizes = [2, 96], strides = [1, 1]} : vector<2x128xf32> to vector<2x96xf32>
    %161 = arith.negf %160 : vector<2x96xf32>
    %162 = math.exp %161 : vector<2x96xf32>
    %cst_33 = arith.constant 1.000000e+00 : f32
    %163 = vector.broadcast %cst_33 : f32 to vector<2x96xf32>
    %164 = arith.addf %163, %162 : vector<2x96xf32>
    %165 = arith.divf %163, %164 : vector<2x96xf32>
    %166 = vector.extract_strided_slice %165 {offsets = [0, 0], sizes = [2, 32], strides = [1, 1]} : vector<2x96xf32> to vector<2x32xf32>
    %167 = vector.extract_strided_slice %165 {offsets = [0, 32], sizes = [2, 32], strides = [1, 1]} : vector<2x96xf32> to vector<2x32xf32>
    %168 = vector.extract_strided_slice %165 {offsets = [0, 64], sizes = [2, 32], strides = [1, 1]} : vector<2x96xf32> to vector<2x32xf32>
    %169 = vector.extract_strided_slice %159 {offsets = [0, 96], sizes = [2, 32], strides = [1, 1]} : vector<2x128xf32> to vector<2x32xf32>
    %170 = math.tanh %169 : vector<2x32xf32>
    %171 = arith.mulf %167, %153 : vector<2x32xf32>
    %172 = arith.mulf %166, %170 : vector<2x32xf32>
    %173 = arith.addf %171, %172 : vector<2x32xf32>
    %174 = math.tanh %173 : vector<2x32xf32>
    %175 = arith.mulf %168, %174 : vector<2x32xf32>
    %176 = vector.extract_strided_slice %11 {offsets = [0, 0], sizes = [2, 128], strides = [1, 1]} : vector<12x128xf32> to vector<2x128xf32>
    %177 = arith.truncf %175 : vector<2x32xf32> to vector<2x32xbf16>
    %cst_34 = arith.constant dense<0.000000e+00> : vector<2x128xf32>
    %178 = tpu.matmul %177, %13, %cst_34 {dimension_numbers = #tpu.dot_dimension_numbers<[1], [0], [0], [1], [0, 0, 1, 1], [], []>} : vector<2x32xbf16>, vector<32x128xbf16>, vector<2x128xf32> -> vector<2x128xf32>
    %179 = arith.addf %176, %178 : vector<2x128xf32>
    %180 = vector.extract_strided_slice %179 {offsets = [0, 0], sizes = [2, 96], strides = [1, 1]} : vector<2x128xf32> to vector<2x96xf32>
    %181 = arith.negf %180 : vector<2x96xf32>
    %182 = math.exp %181 : vector<2x96xf32>
    %cst_35 = arith.constant 1.000000e+00 : f32
    %183 = vector.broadcast %cst_35 : f32 to vector<2x96xf32>
    %184 = arith.addf %183, %182 : vector<2x96xf32>
    %185 = arith.divf %183, %184 : vector<2x96xf32>
    %186 = vector.extract_strided_slice %185 {offsets = [0, 0], sizes = [2, 32], strides = [1, 1]} : vector<2x96xf32> to vector<2x32xf32>
    %187 = vector.extract_strided_slice %185 {offsets = [0, 32], sizes = [2, 32], strides = [1, 1]} : vector<2x96xf32> to vector<2x32xf32>
    %188 = vector.extract_strided_slice %185 {offsets = [0, 64], sizes = [2, 32], strides = [1, 1]} : vector<2x96xf32> to vector<2x32xf32>
    %189 = vector.extract_strided_slice %179 {offsets = [0, 96], sizes = [2, 32], strides = [1, 1]} : vector<2x128xf32> to vector<2x32xf32>
    %190 = math.tanh %189 : vector<2x32xf32>
    %191 = arith.mulf %187, %173 : vector<2x32xf32>
    %192 = arith.mulf %186, %190 : vector<2x32xf32>
    %193 = arith.addf %191, %192 : vector<2x32xf32>
    %194 = math.tanh %193 : vector<2x32xf32>
    %195 = arith.mulf %188, %194 : vector<2x32xf32>
    %c0_36 = arith.constant 0 : index
    %c0_37 = arith.constant 0 : index
    %196 = vector.load %arg11[%c0_36, %c0_37] : memref<12x32xf32, #tpu.memory_space<vmem>>, vector<2x32xf32>
    tpu.vector_store %arg11[%c0_36, %c0_37], %195 {strides = array<i32>} : memref<12x32xf32, #tpu.memory_space<vmem>>, vector<2x32xf32>,
    %197 = vector.extract_strided_slice %11 {offsets = [2, 0], sizes = [2, 128], strides = [1, 1]} : vector<12x128xf32> to vector<2x128xf32>
    %198 = arith.truncf %195 : vector<2x32xf32> to vector<2x32xbf16>
    %cst_38 = arith.constant dense<0.000000e+00> : vector<2x128xf32>
    %199 = tpu.matmul %198, %13, %cst_38 {dimension_numbers = #tpu.dot_dimension_numbers<[1], [0], [0], [1], [0, 0, 1, 1], [], []>} : vector<2x32xbf16>, vector<32x128xbf16>, vector<2x128xf32> -> vector<2x128xf32>
    %200 = arith.addf %197, %199 : vector<2x128xf32>
    %201 = vector.extract_strided_slice %200 {offsets = [0, 0], sizes = [2, 96], strides = [1, 1]} : vector<2x128xf32> to vector<2x96xf32>
    %202 = arith.negf %201 : vector<2x96xf32>
    %203 = math.exp %202 : vector<2x96xf32>
    %cst_39 = arith.constant 1.000000e+00 : f32
    %204 = vector.broadcast %cst_39 : f32 to vector<2x96xf32>
    %205 = arith.addf %204, %203 : vector<2x96xf32>
    %206 = arith.divf %204, %205 : vector<2x96xf32>
    %207 = vector.extract_strided_slice %206 {offsets = [0, 0], sizes = [2, 32], strides = [1, 1]} : vector<2x96xf32> to vector<2x32xf32>
    %208 = vector.extract_strided_slice %206 {offsets = [0, 32], sizes = [2, 32], strides = [1, 1]} : vector<2x96xf32> to vector<2x32xf32>
    %209 = vector.extract_strided_slice %206 {offsets = [0, 64], sizes = [2, 32], strides = [1, 1]} : vector<2x96xf32> to vector<2x32xf32>
    %210 = vector.extract_strided_slice %200 {offsets = [0, 96], sizes = [2, 32], strides = [1, 1]} : vector<2x128xf32> to vector<2x32xf32>
    %211 = math.tanh %210 : vector<2x32xf32>
    %212 = arith.mulf %208, %193 : vector<2x32xf32>
    %213 = arith.mulf %207, %211 : vector<2x32xf32>
    %214 = arith.addf %212, %213 : vector<2x32xf32>
    %215 = math.tanh %214 : vector<2x32xf32>
    %216 = arith.mulf %209, %215 : vector<2x32xf32>
    %c2 = arith.constant 2 : index
    %c0_40 = arith.constant 0 : index
    %217 = vector.load %arg11[%c2, %c0_40] : memref<12x32xf32, #tpu.memory_space<vmem>>, vector<2x32xf32>
    tpu.vector_store %arg11[%c2, %c0_40], %216 {strides = array<i32>} : memref<12x32xf32, #tpu.memory_space<vmem>>, vector<2x32xf32>,
    %218 = vector.extract_strided_slice %11 {offsets = [4, 0], sizes = [2, 128], strides = [1, 1]} : vector<12x128xf32> to vector<2x128xf32>
    %219 = arith.truncf %216 : vector<2x32xf32> to vector<2x32xbf16>
    %cst_41 = arith.constant dense<0.000000e+00> : vector<2x128xf32>
    %220 = tpu.matmul %219, %13, %cst_41 {dimension_numbers = #tpu.dot_dimension_numbers<[1], [0], [0], [1], [0, 0, 1, 1], [], []>} : vector<2x32xbf16>, vector<32x128xbf16>, vector<2x128xf32> -> vector<2x128xf32>
    %221 = arith.addf %218, %220 : vector<2x128xf32>
    %222 = vector.extract_strided_slice %221 {offsets = [0, 0], sizes = [2, 96], strides = [1, 1]} : vector<2x128xf32> to vector<2x96xf32>
    %223 = arith.negf %222 : vector<2x96xf32>
    %224 = math.exp %223 : vector<2x96xf32>
    %cst_42 = arith.constant 1.000000e+00 : f32
    %225 = vector.broadcast %cst_42 : f32 to vector<2x96xf32>
    %226 = arith.addf %225, %224 : vector<2x96xf32>
    %227 = arith.divf %225, %226 : vector<2x96xf32>
    %228 = vector.extract_strided_slice %227 {offsets = [0, 0], sizes = [2, 32], strides = [1, 1]} : vector<2x96xf32> to vector<2x32xf32>
    %229 = vector.extract_strided_slice %227 {offsets = [0, 32], sizes = [2, 32], strides = [1, 1]} : vector<2x96xf32> to vector<2x32xf32>
    %230 = vector.extract_strided_slice %227 {offsets = [0, 64], sizes = [2, 32], strides = [1, 1]} : vector<2x96xf32> to vector<2x32xf32>
    %231 = vector.extract_strided_slice %221 {offsets = [0, 96], sizes = [2, 32], strides = [1, 1]} : vector<2x128xf32> to vector<2x32xf32>
    %232 = math.tanh %231 : vector<2x32xf32>
    %233 = arith.mulf %229, %214 : vector<2x32xf32>
    %234 = arith.mulf %228, %232 : vector<2x32xf32>
    %235 = arith.addf %233, %234 : vector<2x32xf32>
    %236 = math.tanh %235 : vector<2x32xf32>
    %237 = arith.mulf %230, %236 : vector<2x32xf32>
    %c4 = arith.constant 4 : index
    %c0_43 = arith.constant 0 : index
    %238 = vector.load %arg11[%c4, %c0_43] : memref<12x32xf32, #tpu.memory_space<vmem>>, vector<2x32xf32>
    tpu.vector_store %arg11[%c4, %c0_43], %237 {strides = array<i32>} : memref<12x32xf32, #tpu.memory_space<vmem>>, vector<2x32xf32>,
    %239 = vector.extract_strided_slice %11 {offsets = [6, 0], sizes = [2, 128], strides = [1, 1]} : vector<12x128xf32> to vector<2x128xf32>
    %240 = arith.truncf %237 : vector<2x32xf32> to vector<2x32xbf16>
    %cst_44 = arith.constant dense<0.000000e+00> : vector<2x128xf32>
    %241 = tpu.matmul %240, %13, %cst_44 {dimension_numbers = #tpu.dot_dimension_numbers<[1], [0], [0], [1], [0, 0, 1, 1], [], []>} : vector<2x32xbf16>, vector<32x128xbf16>, vector<2x128xf32> -> vector<2x128xf32>
    %242 = arith.addf %239, %241 : vector<2x128xf32>
    %243 = vector.extract_strided_slice %242 {offsets = [0, 0], sizes = [2, 96], strides = [1, 1]} : vector<2x128xf32> to vector<2x96xf32>
    %244 = arith.negf %243 : vector<2x96xf32>
    %245 = math.exp %244 : vector<2x96xf32>
    %cst_45 = arith.constant 1.000000e+00 : f32
    %246 = vector.broadcast %cst_45 : f32 to vector<2x96xf32>
    %247 = arith.addf %246, %245 : vector<2x96xf32>
    %248 = arith.divf %246, %247 : vector<2x96xf32>
    %249 = vector.extract_strided_slice %248 {offsets = [0, 0], sizes = [2, 32], strides = [1, 1]} : vector<2x96xf32> to vector<2x32xf32>
    %250 = vector.extract_strided_slice %248 {offsets = [0, 32], sizes = [2, 32], strides = [1, 1]} : vector<2x96xf32> to vector<2x32xf32>
    %251 = vector.extract_strided_slice %248 {offsets = [0, 64], sizes = [2, 32], strides = [1, 1]} : vector<2x96xf32> to vector<2x32xf32>
    %252 = vector.extract_strided_slice %242 {offsets = [0, 96], sizes = [2, 32], strides = [1, 1]} : vector<2x128xf32> to vector<2x32xf32>
    %253 = math.tanh %252 : vector<2x32xf32>
    %254 = arith.mulf %250, %235 : vector<2x32xf32>
    %255 = arith.mulf %249, %253 : vector<2x32xf32>
    %256 = arith.addf %254, %255 : vector<2x32xf32>
    %257 = math.tanh %256 : vector<2x32xf32>
    %258 = arith.mulf %251, %257 : vector<2x32xf32>
    %c6 = arith.constant 6 : index
    %c0_46 = arith.constant 0 : index
    %259 = vector.load %arg11[%c6, %c0_46] : memref<12x32xf32, #tpu.memory_space<vmem>>, vector<2x32xf32>
    tpu.vector_store %arg11[%c6, %c0_46], %258 {strides = array<i32>} : memref<12x32xf32, #tpu.memory_space<vmem>>, vector<2x32xf32>,
    %260 = vector.extract_strided_slice %11 {offsets = [8, 0], sizes = [2, 128], strides = [1, 1]} : vector<12x128xf32> to vector<2x128xf32>
    %261 = arith.truncf %258 : vector<2x32xf32> to vector<2x32xbf16>
    %cst_47 = arith.constant dense<0.000000e+00> : vector<2x128xf32>
    %262 = tpu.matmul %261, %13, %cst_47 {dimension_numbers = #tpu.dot_dimension_numbers<[1], [0], [0], [1], [0, 0, 1, 1], [], []>} : vector<2x32xbf16>, vector<32x128xbf16>, vector<2x128xf32> -> vector<2x128xf32>
    %263 = arith.addf %260, %262 : vector<2x128xf32>
    %264 = vector.extract_strided_slice %263 {offsets = [0, 0], sizes = [2, 96], strides = [1, 1]} : vector<2x128xf32> to vector<2x96xf32>
    %265 = arith.negf %264 : vector<2x96xf32>
    %266 = math.exp %265 : vector<2x96xf32>
    %cst_48 = arith.constant 1.000000e+00 : f32
    %267 = vector.broadcast %cst_48 : f32 to vector<2x96xf32>
    %268 = arith.addf %267, %266 : vector<2x96xf32>
    %269 = arith.divf %267, %268 : vector<2x96xf32>
    %270 = vector.extract_strided_slice %269 {offsets = [0, 0], sizes = [2, 32], strides = [1, 1]} : vector<2x96xf32> to vector<2x32xf32>
    %271 = vector.extract_strided_slice %269 {offsets = [0, 32], sizes = [2, 32], strides = [1, 1]} : vector<2x96xf32> to vector<2x32xf32>
    %272 = vector.extract_strided_slice %269 {offsets = [0, 64], sizes = [2, 32], strides = [1, 1]} : vector<2x96xf32> to vector<2x32xf32>
    %273 = vector.extract_strided_slice %263 {offsets = [0, 96], sizes = [2, 32], strides = [1, 1]} : vector<2x128xf32> to vector<2x32xf32>
    %274 = math.tanh %273 : vector<2x32xf32>
    %275 = arith.mulf %271, %256 : vector<2x32xf32>
    %276 = arith.mulf %270, %274 : vector<2x32xf32>
    %277 = arith.addf %275, %276 : vector<2x32xf32>
    %278 = math.tanh %277 : vector<2x32xf32>
    %279 = arith.mulf %272, %278 : vector<2x32xf32>
    %c8 = arith.constant 8 : index
    %c0_49 = arith.constant 0 : index
    %280 = vector.load %arg11[%c8, %c0_49] : memref<12x32xf32, #tpu.memory_space<vmem>>, vector<2x32xf32>
    tpu.vector_store %arg11[%c8, %c0_49], %279 {strides = array<i32>} : memref<12x32xf32, #tpu.memory_space<vmem>>, vector<2x32xf32>,
    %281 = vector.extract_strided_slice %11 {offsets = [10, 0], sizes = [2, 128], strides = [1, 1]} : vector<12x128xf32> to vector<2x128xf32>
    %282 = arith.truncf %279 : vector<2x32xf32> to vector<2x32xbf16>
    %cst_50 = arith.constant dense<0.000000e+00> : vector<2x128xf32>
    %283 = tpu.matmul %282, %13, %cst_50 {dimension_numbers = #tpu.dot_dimension_numbers<[1], [0], [0], [1], [0, 0, 1, 1], [], []>} : vector<2x32xbf16>, vector<32x128xbf16>, vector<2x128xf32> -> vector<2x128xf32>
    %284 = arith.addf %281, %283 : vector<2x128xf32>
    %285 = vector.extract_strided_slice %284 {offsets = [0, 0], sizes = [2, 96], strides = [1, 1]} : vector<2x128xf32> to vector<2x96xf32>
    %286 = arith.negf %285 : vector<2x96xf32>
    %287 = math.exp %286 : vector<2x96xf32>
    %cst_51 = arith.constant 1.000000e+00 : f32
    %288 = vector.broadcast %cst_51 : f32 to vector<2x96xf32>
    %289 = arith.addf %288, %287 : vector<2x96xf32>
    %290 = arith.divf %288, %289 : vector<2x96xf32>
    %291 = vector.extract_strided_slice %290 {offsets = [0, 0], sizes = [2, 32], strides = [1, 1]} : vector<2x96xf32> to vector<2x32xf32>
    %292 = vector.extract_strided_slice %290 {offsets = [0, 32], sizes = [2, 32], strides = [1, 1]} : vector<2x96xf32> to vector<2x32xf32>
    %293 = vector.extract_strided_slice %290 {offsets = [0, 64], sizes = [2, 32], strides = [1, 1]} : vector<2x96xf32> to vector<2x32xf32>
    %294 = vector.extract_strided_slice %284 {offsets = [0, 96], sizes = [2, 32], strides = [1, 1]} : vector<2x128xf32> to vector<2x32xf32>
    %295 = math.tanh %294 : vector<2x32xf32>
    %296 = arith.mulf %292, %277 : vector<2x32xf32>
    %297 = arith.mulf %291, %295 : vector<2x32xf32>
    %298 = arith.addf %296, %297 : vector<2x32xf32>
    %299 = math.tanh %298 : vector<2x32xf32>
    %300 = arith.mulf %293, %299 : vector<2x32xf32>
    %c10 = arith.constant 10 : index
    %c0_52 = arith.constant 0 : index
    %301 = vector.load %arg11[%c10, %c0_52] : memref<12x32xf32, #tpu.memory_space<vmem>>, vector<2x32xf32>
    tpu.vector_store %arg11[%c10, %c0_52], %300 {strides = array<i32>} : memref<12x32xf32, #tpu.memory_space<vmem>>, vector<2x32xf32>,
    %c0_53 = arith.constant 0 : index
    %c0_54 = arith.constant 0 : index
    %302 = vector.load %arg11[%c0_53, %c0_54] : memref<12x32xf32, #tpu.memory_space<vmem>>, vector<12x32xf32>
    %303 = arith.truncf %302 : vector<12x32xf32> to vector<12x32xbf16>
    %c0_55 = arith.constant 0 : index
    %c0_56 = arith.constant 0 : index
    %304 = vector.load %arg8[%c0_55, %c0_56] : memref<32x4xbf16, #tpu.memory_space<vmem>>, vector<32x4xbf16>
    %cst_57 = arith.constant dense<0.000000e+00> : vector<12x4xf32>
    %305 = tpu.matmul %303, %304, %cst_57 {dimension_numbers = #tpu.dot_dimension_numbers<[1], [0], [0], [1], [0, 0, 1, 1], [], []>} : vector<12x32xbf16>, vector<32x4xbf16>, vector<12x4xf32> -> vector<12x4xf32>
    %c0_58 = arith.constant 0 : index
    %c0_59 = arith.constant 0 : index
    %306 = vector.load %arg9[%c0_58, %c0_59] : memref<1x4xf32, #tpu.memory_space<vmem>>, vector<1x4xf32>
    %307 = vector.broadcast %306 : vector<1x4xf32> to vector<12x4xf32>
    %308 = arith.addf %305, %307 : vector<12x4xf32>
    %c0_60 = arith.constant 0 : index
    %c0_61 = arith.constant 0 : index
    %309 = vector.load %arg10[%c0_60, %c0_61] : memref<12x4xf32, #tpu.memory_space<vmem>>, vector<12x4xf32>
    tpu.vector_store %arg10[%c0_60, %c0_61], %308 {strides = array<i32>} : memref<12x4xf32, #tpu.memory_space<vmem>>, vector<12x4xf32>,
    return
  }
}

</mosaic_0001>

<bundles_post_ra>
// kernel: tpu_custom_call.1
= control target key start
LH: loop header
LB: loop body
LE: loop exit
PB: predicated region body
PF: predicated region fallthrough
CT: control target
= control target key end

     0   :  { %vm52_vm0 = vcmask 1041408   ;;  %vm48_vm1 = vcmask 31744   ;;  %v1290_v5 = vmov 0   ;;  %vm122_vm6 = vcmask 261120   ;;  %s1550_s2 = inlined_call_operand.vmem [shape: bf16[4,128], index: 2, kind: input, shape index: {}]   ;;  %s1551_s3 = inlined_call_operand.vmem [shape: bf16[32,128], index: 3, kind: input, shape index: {}]   ;;  %s1552_s0 = inlined_call_operand.vmem [shape: bf16[16,4], index: 0, kind: input, shape index: {}]   ;;  %s1553_s4 = inlined_call_operand.vmem [shape: f32[1,128], index: 4, kind: input, shape index: {}]   ;;  %s1554_s7 = inlined_call_operand.vmem [shape: f32[1,128], index: 7, kind: input, shape index: {}]   ;;  %s1555_s5 = inlined_call_operand.vmem [shape: bf16[4,128], index: 5, kind: input, shape index: {}]   ;;  %s1556_s1 = inlined_call_operand.vmem [shape: bf16[12,4], index: 1, kind: input, shape index: {}]   ;;  %s1557_s6 = inlined_call_operand.vmem [shape: bf16[32,128], index: 6, kind: input, shape index: {}]   ;;  %s1558_s8 = inlined_call_operand.vmem [shape: bf16[32,4], index: 8, kind: input, shape index: {}]   ;;  %s1559_s9 = inlined_call_operand.vmem [shape: f32[1,4], index: 9, kind: input, shape index: {}]   ;;  %s1560_s10 = inlined_call_operand.vmem [shape: f32[12,4], index: 10, kind: output, shape index: {}]  }
   0x1   :  { %v38_v0 = vld [vmem:[%s1550_s2] sm:$0x3]  ;;  %v1354_v1 = vld [vmem:[%s1551_s3 + $0x8] sm:$0xff] }
   0x2   :  { %v54_v2 = vsel %vm52_vm0, %v38_v0, 0  ;;  %v1164_v3 = vld [vmem:[%s1552_s0] sm:$0xff]  ;;  %132 = vmatpush.bf16.msra.mxu2 %v1354_v1  ;;  %190 = vmatpush.bf16.msra.mxu3 %v1354_v1 }
   0x3   :  { %63 = vmatpush.bf16.msra.mxu0 %v54_v2  ;;  %v1364_v4 = vld [vmem:[%s1551_s3] sm:$0xff]  ;;  %s1291_s3 = smov 32  }
   0x4   :  { %v1381_v6 = vld [vmem:[%s1553_s4] ss:$0 sm:$0xff]  ;;  %s1292_s4 = smov 64  }
   0x6   :  { %1106 = vmatmul.msk.bf16.vlgmr.msra.gmra.mxu0 %vm48_vm1, %v1164_v3  ;;  %133 = vmatpush.bf16.msra.mxu2 %v1364_v4 }
   0x7   :  { %255 = vmatpush.bf16.msrb.mxu0 %v1354_v1  ;;  %191 = vmatpush.bf16.msra.mxu3 %v1364_v4 }
   0x9   :  { %134 = vmatmul.bf16.vlgmr.msra.gmra.mxu2 %v1290_v5 }
   0xa   :  { %385 = vmatpush.bf16.msrb.mxu2 %v1354_v1 }
   0xb   :  { %256 = vmatpush.bf16.msrb.mxu0 %v1364_v4  ;;  %446 = vmatpush.bf16.msrb.mxu3 %v1354_v1 }
   0xe   :  { %386 = vmatpush.bf16.msrb.mxu2 %v1364_v4 }
   0xf   :  { %511 = vmatpush.bf16.msra.mxu0 %v1354_v1  ;;  %447 = vmatpush.bf16.msrb.mxu3 %v1364_v4 }
  0x13   :  { %512 = vmatpush.bf16.msra.mxu0 %v1364_v4 }
  0x83   :  { %v65_v7 = vpop.f32.mrf.mxu0 }
  0x84   :  { %v1384_v8 = vadd.f32 %v1381_v6, %v65_v7 }
  0x8b   :  { %v1398_v3 = vpop.f32.mrf.mxu0 }
  0x8c   :  { %v135_v9 = vpop.f32.mrf.mxu2 }
  0x8d   :  { %v139_v10 = vadd.f32 %v135_v9, %v1384_v8 }
  0x8f   :  { %1178 = vtanh.f32 %v139_v10  ;;  %v1120_v13 = vmul.f32 -1.442695, %v139_v10 }
  0x91   :  { %1180 = vpow2.f32 %v1120_v13 }
  0x94   :  { %v137_v11 = vpop.f32.mrf.mxu2 }
  0x95   :  { %v1179_v12 = vpop.eup %1178 }
  0x96   :  { %162 = vrot.lane.b32.xlu0 %v1179_v12, %s1291_s3 }
  0x97   :  { %v1181_v14 = vpop.eup %1180 }
  0x98   :  { %v143_v15 = vadd.f32 1.0, %v1181_v14 }
  0x9a   :  { %1182 = vrcp.f32 %v143_v15  ;;  %v155_v21 = vand.u32 2147483648, %v143_v15  ;;  %vm149_vm3 = vweird.f32 %v143_v15  ;;  %v153_v22 = vand.u32 2147483647, %v143_v15 }
  0x9c   :  { %v156_v24 = vor.u32 1.1754944e-38, %v155_v21  ;;  %vm154_vm5 = vcmp.eq.f32.partialorder %v153_v22, 8.507059e+37 }
  0xa0   :  { %v1183_v16 = vpop.eup %1182 }
  0xa1   :  { %v145_v17 = vmul.f32 %v1183_v16, %v143_v15  ;;  %vm150_vm2 = vweird.f32 %v1183_v16 }
  0xa2   :  { %vm151_vm4 = vmor %vm149_vm3, %vm150_vm2 }
  0xa3   :  { %v146_v18 = vsub.f32 1.0, %v145_v17 }
  0xa5   :  { %v147_v19 = vmul.f32 %v1183_v16, %v146_v18 }
  0xa7   :  { %v148_v20 = vadd.f32 %v1183_v16, %v147_v19 }
  0xa9   :  { %v152_v23 = vsel %vm151_vm4, %v1183_v16, %v148_v20 }
  0xaa   :  { %v157_v26 = vsel %vm154_vm5, %v156_v24, %v152_v23 }
  0xab   :  { %v160_v28 = vmul.f32 0.0, %v157_v26 }
 0x108   :  { %v163_v25 = vpop.permute.xlu0 %162 }
 0x109   :  { %v165_v27 = vmul.f32 %v163_v25, %v157_v26 }
 0x10b   :  { %167 = vrot.lane.b32.xlu0 %v165_v27, %s1291_s3 }
 0x17d   :  { %v168_v29 = vpop.permute.xlu0 %167 }
 0x17e   :  { %v170_v30 = vadd.f32 %v168_v29, %v160_v28 }
 0x180   :  { %1184 = vtanh.f32 %v170_v30  ;;  %v222_v56 = vrot.slane %v170_v30, 6 }
 0x186   :  { %v1185_v31 = vpop.eup %1184 }
 0x187   :  { %173 = vrot.lane.b32.xlu1 %v1185_v31, %s1291_s3 }
 0x1f9   :  { %v174_v32 = vpop.permute.xlu1 %173 }
 0x1fa   :  { %v176_v33 = vmul.f32 %v174_v32, %v157_v26  ;;  %v72_v32 = vld [vmem:[%s1555_s5] sm:$0x3] }
 0x1fc   :  { %v177_v34 = vpack.c.bf16 %v176_v33, %v176_v33  ;;  %v1109_v33 = vld [vmem:[%s1556_s1] sm:$0xf] }
 0x1fe   :  { %179 = vrot.lane.b32.xlu1 %v177_v34, %s1292_s4  ;;  %v1165_v34 = vld [vmem:[%s1556_s1] sm:$0x30] }
 0x270   :  { %v180_v35 = vpop.permute.xlu1 %179 }
 0x271   :  { %1121 = vmatmul.msk.bf16.vlgmr.msra.gmra.mxu3 %vm122_vm6, %v180_v35  ;;  %v86_v35 = vsel %vm52_vm0, %v72_v32, 0 }
 0x272   :  { %95 = vmatpush.bf16.msra.mxu1 %v86_v35 }
 0x276   :  { %320 = vmatpush.bf16.msrb.mxu1 %v1354_v1 }
 0x27a   :  { %321 = vmatpush.bf16.msrb.mxu1 %v1364_v4 }
 0x2f4   :  { %v193_v36 = vpop.f32.mrf.mxu3 }
 0x2f5   :  { %v198_v37 = vrot.slane %v193_v36, 6  ;;  %v1110_v36 = vor.u32 %v1165_v34, %v1109_v33 }
 0x2f7   :  { %v200_v38 = vadd.f32 %v198_v37, %v1384_v8  ;;  %1111 = vmatmul.msk.bf16.vlgmr.msra.gmra.mxu1 %vm48_vm1, %v1110_v36 }
 0x2f8   :  { %576 = vmatpush.bf16.msra.mxu1 %v1354_v1 }
 0x2f9   :  { %1186 = vtanh.f32 %v200_v38  ;;  %v1122_v41 = vmul.f32 -1.442695, %v200_v38 }
 0x2fb   :  { %1188 = vpow2.f32 %v1122_v41 }
 0x2fc   :  { %v195_v39 = vpop.f32.mrf.mxu3  ;;  %577 = vmatpush.bf16.msra.mxu1 %v1364_v4 }
 0x2ff   :  { %v1187_v40 = vpop.eup %1186 }
 0x300   :  { %226 = vrot.lane.b32.xlu2 %v1187_v40, %s1291_s3 }
 0x301   :  { %v1189_v42 = vpop.eup %1188 }
 0x302   :  { %v204_v43 = vadd.f32 1.0, %v1189_v42 }
 0x304   :  { %1190 = vrcp.f32 %v204_v43  ;;  %v216_v49 = vand.u32 2147483648, %v204_v43  ;;  %vm210_vm8 = vweird.f32 %v204_v43  ;;  %v214_v50 = vand.u32 2147483647, %v204_v43 }
 0x306   :  { %v217_v52 = vor.u32 1.1754944e-38, %v216_v49  ;;  %vm215_vm10 = vcmp.eq.f32.partialorder %v214_v50, 8.507059e+37 }
 0x30a   :  { %v1191_v44 = vpop.eup %1190 }
 0x30b   :  { %v206_v45 = vmul.f32 %v1191_v44, %v204_v43  ;;  %vm211_vm7 = vweird.f32 %v1191_v44 }
 0x30c   :  { %vm212_vm9 = vmor %vm210_vm8, %vm211_vm7 }
 0x30d   :  { %v207_v46 = vsub.f32 1.0, %v206_v45 }
 0x30f   :  { %v208_v47 = vmul.f32 %v1191_v44, %v207_v46 }
 0x311   :  { %v209_v48 = vadd.f32 %v1191_v44, %v208_v47 }
 0x313   :  { %v213_v51 = vsel %vm212_vm9, %v1191_v44, %v209_v48 }
 0x314   :  { %v218_v54 = vsel %vm215_vm10, %v217_v52, %v213_v51 }
 0x315   :  { %v224_v57 = vmul.f32 %v222_v56, %v218_v54 }
 0x35a   :  { %v227_v53 = vpop.permute.xlu2 %226 }
 0x35b   :  { %v229_v55 = vmul.f32 %v227_v53, %v218_v54 }
 0x35d   :  { %231 = vrot.lane.b32.xlu2 %v229_v55, %s1291_s3 }
 0x374   :  { %v1421_v42 = vpop.f32.mrf.mxu1 }
 0x37c   :  { %v1423_v43 = vpop.f32.mrf.mxu1 }
 0x3b7   :  { %v232_v58 = vpop.permute.xlu2 %231 }
 0x3b8   :  { %v234_v59 = vadd.f32 %v232_v58, %v224_v57 }
 0x3ba   :  { %1192 = vtanh.f32 %v234_v59  ;;  %v287_v27 = vrot.slane %v234_v59, 6 }
 0x3c0   :  { %v1193_v60 = vpop.eup %1192 }
 0x3c1   :  { %237 = vrot.lane.b32.xlu0 %v1193_v60, %s1291_s3 }
 0x433   :  { %v238_v61 = vpop.permute.xlu0 %237 }
 0x434   :  { %v240_v62 = vmul.f32 %v238_v61, %v218_v54 }
 0x436   :  { %v241_v63 = vpack.c.bf16 %v240_v62, %v240_v62 }
 0x438   :  { %v243_v0 = vrot.slane %v241_v63, 1 }
 0x43a   :  { %244 = vrot.lane.b32.xlu1 %v243_v0, %s1292_s4 }
 0x4ac   :  { %v245_v2 = vpop.permute.xlu1 %244 }
 0x4ad   :  { %1123 = vmatmul.msk.bf16.vlgmr.msrb.gmra.mxu0 %vm122_vm6, %v245_v2 }
 0x52a   :  { %v258_v5 = vpop.f32.mrf.mxu0 }
 0x52b   :  { %v263_v7 = vrot.slane %v258_v5, 4 }
 0x52d   :  { %v265_v9 = vadd.f32 %v263_v7, %v1384_v8 }
 0x52f   :  { %1194 = vtanh.f32 %v265_v9  ;;  %v1124_v12 = vmul.f32 -1.442695, %v265_v9 }
 0x531   :  { %1196 = vpow2.f32 %v1124_v12  ;;  %v1433_v12 = vadd.f32 %v1381_v6, %v1398_v3 }
 0x532   :  { %v260_v10 = vpop.f32.mrf.mxu0 }
 0x535   :  { %v1195_v11 = vpop.eup %1194 }
 0x536   :  { %291 = vrot.lane.b32.xlu2 %v1195_v11, %s1291_s3 }
 0x537   :  { %v1197_v13 = vpop.eup %1196 }
 0x538   :  { %v269_v14 = vadd.f32 1.0, %v1197_v13 }
 0x53a   :  { %1198 = vrcp.f32 %v269_v14  ;;  %v281_v20 = vand.u32 2147483648, %v269_v14  ;;  %vm275_vm12 = vweird.f32 %v269_v14  ;;  %v279_v21 = vand.u32 2147483647, %v269_v14 }
 0x53c   :  { %v282_v23 = vor.u32 1.1754944e-38, %v281_v20  ;;  %vm280_vm14 = vcmp.eq.f32.partialorder %v279_v21, 8.507059e+37 }
 0x540   :  { %v1199_v15 = vpop.eup %1198 }
 0x541   :  { %v271_v16 = vmul.f32 %v1199_v15, %v269_v14  ;;  %vm276_vm11 = vweird.f32 %v1199_v15 }
 0x542   :  { %vm277_vm13 = vmor %vm275_vm12, %vm276_vm11 }
 0x543   :  { %v272_v17 = vsub.f32 1.0, %v271_v16 }
 0x545   :  { %v273_v18 = vmul.f32 %v1199_v15, %v272_v17 }
 0x547   :  { %v274_v19 = vadd.f32 %v1199_v15, %v273_v18 }
 0x549   :  { %v278_v22 = vsel %vm277_vm13, %v1199_v15, %v274_v19 }
 0x54a   :  { %v283_v25 = vsel %vm280_vm14, %v282_v23, %v278_v22 }
 0x54b   :  { %v289_v28 = vmul.f32 %v287_v27, %v283_v25 }
 0x590   :  { %v292_v24 = vpop.permute.xlu2 %291 }
 0x591   :  { %v294_v26 = vmul.f32 %v292_v24, %v283_v25 }
 0x593   :  { %296 = vrot.lane.b32.xlu0 %v294_v26, %s1291_s3 }
 0x605   :  { %v297_v29 = vpop.permute.xlu0 %296 }
 0x606   :  { %v299_v30 = vadd.f32 %v297_v29, %v289_v28 }
 0x608   :  { %1200 = vtanh.f32 %v299_v30  ;;  %v352_v61 = vrot.slane %v299_v30, 6 }
 0x60e   :  { %v1201_v31 = vpop.eup %1200 }
 0x60f   :  { %302 = vrot.lane.b32.xlu1 %v1201_v31, %s1291_s3 }
 0x681   :  { %v303_v37 = vpop.permute.xlu1 %302 }
 0x682   :  { %v305_v38 = vmul.f32 %v303_v37, %v283_v25 }
 0x684   :  { %v306_v39 = vpack.c.bf16 %v305_v38, %v305_v38 }
 0x686   :  { %v308_v40 = vrot.slane %v306_v39, 2 }
 0x688   :  { %309 = vrot.lane.b32.xlu2 %v308_v40, %s1292_s4 }
 0x6e2   :  { %v310_v41 = vpop.permute.xlu2 %309 }
 0x6e3   :  { %1125 = vmatmul.msk.bf16.vlgmr.msrb.gmra.mxu1 %vm122_vm6, %v310_v41 }
 0x760   :  { %v323_v44 = vpop.f32.mrf.mxu1 }
 0x761   :  { %v328_v45 = vrot.slane %v323_v44, 2 }
 0x763   :  { %v330_v46 = vadd.f32 %v328_v45, %v1384_v8 }
 0x765   :  { %1202 = vtanh.f32 %v330_v46  ;;  %v1126_v47 = vmul.f32 -1.442695, %v330_v46 }
 0x767   :  { %1204 = vpow2.f32 %v1126_v47 }
 0x768   :  { %v325_v1 = vpop.f32.mrf.mxu1 }
 0x76b   :  { %v1203_v4 = vpop.eup %1202 }
 0x76c   :  { %356 = vrot.lane.b32.xlu0 %v1203_v4, %s1291_s3 }
 0x76d   :  { %v1205_v48 = vpop.eup %1204 }
 0x76e   :  { %v334_v49 = vadd.f32 1.0, %v1205_v48 }
 0x770   :  { %1206 = vrcp.f32 %v334_v49  ;;  %v346_v55 = vand.u32 2147483648, %v334_v49  ;;  %vm340_vm0 = vweird.f32 %v334_v49  ;;  %v344_v56 = vand.u32 2147483647, %v334_v49 }
 0x772   :  { %v347_v57 = vor.u32 1.1754944e-38, %v346_v55  ;;  %vm345_vm3 = vcmp.eq.f32.partialorder %v344_v56, 8.507059e+37 }
 0x776   :  { %v1207_v50 = vpop.eup %1206 }
 0x777   :  { %v336_v51 = vmul.f32 %v1207_v50, %v334_v49  ;;  %vm341_vm15 = vweird.f32 %v1207_v50 }
 0x778   :  { %vm342_vm2 = vmor %vm340_vm0, %vm341_vm15 }
 0x779   :  { %v337_v52 = vsub.f32 1.0, %v336_v51 }
 0x77b   :  { %v338_v53 = vmul.f32 %v1207_v50, %v337_v52 }
 0x77d   :  { %v339_v54 = vadd.f32 %v1207_v50, %v338_v53 }
 0x77f   :  { %v343_v8 = vsel %vm342_vm2, %v1207_v50, %v339_v54 }
 0x780   :  { %v348_v59 = vsel %vm345_vm3, %v347_v57, %v343_v8 }
 0x781   :  { %v354_v62 = vmul.f32 %v352_v61, %v348_v59 }
 0x7de   :  { %v357_v58 = vpop.permute.xlu0 %356 }
 0x7df   :  { %v359_v60 = vmul.f32 %v357_v58, %v348_v59 }
 0x7e1   :  { %361 = vrot.lane.b32.xlu1 %v359_v60, %s1291_s3 }
 0x853   :  { %v362_v63 = vpop.permute.xlu1 %361 }
 0x854   :  { %v364_v0 = vadd.f32 %v362_v63, %v354_v62 }
 0x856   :  { %1208 = vtanh.f32 %v364_v0  ;;  %v414_v30 = vrot.slane %v364_v0, 6 }
 0x85c   :  { %v1209_v2 = vpop.eup %1208 }
 0x85d   :  { %367 = vrot.lane.b32.xlu2 %v1209_v2, %s1291_s3 }
 0x8b7   :  { %v368_v5 = vpop.permute.xlu2 %367 }
 0x8b8   :  { %v370_v7 = vmul.f32 %v368_v5, %v348_v59 }
 0x8ba   :  { %v371_v9 = vpack.c.bf16 %v370_v7, %v370_v7 }
 0x8bc   :  { %v373_v10 = vrot.slane %v371_v9, 3 }
 0x8be   :  { %374 = vrot.lane.b32.xlu0 %v373_v10, %s1292_s4 }
 0x930   :  { %v375_v11 = vpop.permute.xlu0 %374 }
 0x931   :  { %1127 = vmatmul.msk.bf16.vlgmr.msrb.gmra.mxu2 %vm122_vm6, %v375_v11 }
 0x9b4   :  { %v388_v13 = vpop.f32.mrf.mxu2 }
 0x9b5   :  { %v392_v14 = vadd.f32 %v388_v13, %v1433_v12 }
 0x9b7   :  { %1210 = vtanh.f32 %v392_v14  ;;  %v1128_v17 = vmul.f32 -1.442695, %v392_v14 }
 0x9b9   :  { %1212 = vpow2.f32 %v1128_v17 }
 0x9bc   :  { %v390_v15 = vpop.f32.mrf.mxu2 }
 0x9bd   :  { %v1211_v16 = vpop.eup %1210 }
 0x9be   :  { %418 = vrot.lane.b32.xlu1 %v1211_v16, %s1291_s3 }
 0x9bf   :  { %v1213_v18 = vpop.eup %1212 }
 0x9c0   :  { %v396_v19 = vadd.f32 1.0, %v1213_v18 }
 0x9c2   :  { %1214 = vrcp.f32 %v396_v19  ;;  %v408_v6 = vand.u32 2147483648, %v396_v19  ;;  %vm402_vm5 = vweird.f32 %v396_v19  ;;  %v406_v3 = vand.u32 2147483647, %v396_v19 }
 0x9c4   :  { %v409_v26 = vor.u32 1.1754944e-38, %v408_v6  ;;  %vm407_vm8 = vcmp.eq.f32.partialorder %v406_v3, 8.507059e+37 }
 0x9c8   :  { %v1215_v20 = vpop.eup %1214 }
 0x9c9   :  { %v398_v21 = vmul.f32 %v1215_v20, %v396_v19  ;;  %vm403_vm4 = vweird.f32 %v1215_v20 }
 0x9ca   :  { %vm404_vm7 = vmor %vm402_vm5, %vm403_vm4 }
 0x9cb   :  { %v399_v22 = vsub.f32 1.0, %v398_v21 }
 0x9cd   :  { %v400_v23 = vmul.f32 %v1215_v20, %v399_v22 }
 0x9cf   :  { %v401_v24 = vadd.f32 %v1215_v20, %v400_v23 }
 0x9d1   :  { %v405_v25 = vsel %vm404_vm7, %v1215_v20, %v401_v24 }
 0x9d2   :  { %v410_v28 = vsel %vm407_vm8, %v409_v26, %v405_v25 }
 0x9d3   :  { %v416_v31 = vmul.f32 %v414_v30, %v410_v28 }
 0xa30   :  { %v419_v27 = vpop.permute.xlu1 %418 }
 0xa31   :  { %v421_v29 = vmul.f32 %v419_v27, %v410_v28 }
 0xa33   :  { %423 = vrot.lane.b32.xlu2 %v421_v29, %s1291_s3 }
 0xa8d   :  { %v424_v32 = vpop.permute.xlu2 %423 }
 0xa8e   :  { %v426_v33 = vadd.f32 %v424_v32, %v416_v31 }
 0xa90   :  { %1216 = vtanh.f32 %v426_v33  ;;  %v478_v58 = vrot.slane %v426_v33, 6 }
 0xa96   :  { %v1217_v34 = vpop.eup %1216 }
 0xa97   :  { %429 = vrot.lane.b32.xlu0 %v1217_v34, %s1291_s3 }
 0xb09   :  { %v430_v35 = vpop.permute.xlu0 %429 }
 0xb0a   :  { %v432_v36 = vmul.f32 %v430_v35, %v410_v28 }
 0xb0c   :  { %v433_v37 = vpack.c.bf16 %v432_v36, %v432_v36 }
 0xb0e   :  { %435 = vrot.lane.b32.xlu1 %v433_v37, %s1292_s4 }
 0xb80   :  { %v436_v38 = vpop.permute.xlu1 %435 }
 0xb81   :  { %1129 = vmatmul.msk.bf16.vlgmr.msrb.gmra.mxu3 %vm122_vm6, %v436_v38 }
 0xc04   :  { %v449_v39 = vpop.f32.mrf.mxu3 }
 0xc05   :  { %v454_v40 = vrot.slane %v449_v39, 6 }
 0xc07   :  { %v456_v41 = vadd.f32 %v454_v40, %v1433_v12 }
 0xc09   :  { %1218 = vtanh.f32 %v456_v41  ;;  %v1130_v46 = vmul.f32 -1.442695, %v456_v41 }
 0xc0b   :  { %1220 = vpow2.f32 %v1130_v46 }
 0xc0c   :  { %v451_v44 = vpop.f32.mrf.mxu3 }
 0xc0f   :  { %v1219_v45 = vpop.eup %1218 }
 0xc10   :  { %482 = vrot.lane.b32.xlu2 %v1219_v45, %s1291_s3 }
 0xc11   :  { %v1221_v1 = vpop.eup %1220 }
 0xc12   :  { %v460_v4 = vadd.f32 1.0, %v1221_v1 }
 0xc14   :  { %1222 = vrcp.f32 %v460_v4  ;;  %v472_v52 = vand.u32 2147483648, %v460_v4  ;;  %vm466_vm10 = vweird.f32 %v460_v4  ;;  %v470_v53 = vand.u32 2147483647, %v460_v4 }
 0xc16   :  { %v473_v55 = vor.u32 1.1754944e-38, %v472_v52  ;;  %vm471_vm12 = vcmp.eq.f32.partialorder %v470_v53, 8.507059e+37 }
 0xc1a   :  { %v1223_v47 = vpop.eup %1222 }
 0xc1b   :  { %v462_v48 = vmul.f32 %v1223_v47, %v460_v4  ;;  %vm467_vm9 = vweird.f32 %v1223_v47 }
 0xc1c   :  { %vm468_vm11 = vmor %vm466_vm10, %vm467_vm9 }
 0xc1d   :  { %v463_v49 = vsub.f32 1.0, %v462_v48 }
 0xc1f   :  { %v464_v50 = vmul.f32 %v1223_v47, %v463_v49 }
 0xc21   :  { %v465_v51 = vadd.f32 %v1223_v47, %v464_v50 }
 0xc23   :  { %v469_v54 = vsel %vm468_vm11, %v1223_v47, %v465_v51 }
 0xc24   :  { %v474_v8 = vsel %vm471_vm12, %v473_v55, %v469_v54 }
 0xc25   :  { %v480_v59 = vmul.f32 %v478_v58, %v474_v8 }
 0xc6a   :  { %v483_v56 = vpop.permute.xlu2 %482 }
 0xc6b   :  { %v485_v57 = vmul.f32 %v483_v56, %v474_v8 }
 0xc6d   :  { %487 = vrot.lane.b32.xlu0 %v485_v57, %s1291_s3 }
 0xcdf   :  { %v488_v60 = vpop.permute.xlu0 %487 }
 0xce0   :  { %v490_v61 = vadd.f32 %v488_v60, %v480_v59 }
 0xce2   :  { %1224 = vtanh.f32 %v490_v61  ;;  %v543_v28 = vrot.slane %v490_v61, 6  ;;  %v1169_v61 = vld [vmem:[%s1557_s6 + $0x8] sm:$0xff] }
 0xce3   :  { %653 = vmatpush.bf16.msra.mxu2 %v1169_v61  ;;  %720 = vmatpush.bf16.msra.mxu3 %v1169_v61 }
 0xce4   :  { %791 = vmatpush.bf16.msrb.mxu0 %v1169_v61  ;;  %862 = vmatpush.bf16.msrb.mxu1 %v1169_v61 }
 0xce8   :  { %v1225_v62 = vpop.eup %1224 }
 0xce9   :  { %493 = vrot.lane.b32.xlu1 %v1225_v62, %s1291_s3  ;;  %v1168_v62 = vld [vmem:[%s1557_s6] sm:$0xff] }
 0xcea   :  { %654 = vmatpush.bf16.msra.mxu2 %v1168_v62  ;;  %721 = vmatpush.bf16.msra.mxu3 %v1168_v62 }
 0xceb   :  { %792 = vmatpush.bf16.msrb.mxu0 %v1168_v62  ;;  %863 = vmatpush.bf16.msrb.mxu1 %v1168_v62 }
 0xcee   :  { %933 = vmatpush.bf16.msrb.mxu2 %v1169_v61  ;;  %999 = vmatpush.bf16.msrb.mxu3 %v1169_v61 }
 0xcf2   :  { %934 = vmatpush.bf16.msrb.mxu2 %v1168_v62  ;;  %1000 = vmatpush.bf16.msrb.mxu3 %v1168_v62 }
 0xd5b   :  { %v494_v63 = vpop.permute.xlu1 %493 }
 0xd5c   :  { %v496_v0 = vmul.f32 %v494_v63, %v474_v8 }
 0xd5e   :  { %v497_v2 = vpack.c.bf16 %v496_v0, %v496_v0 }
 0xd60   :  { %v499_v5 = vrot.slane %v497_v2, 1 }
 0xd62   :  { %500 = vrot.lane.b32.xlu2 %v499_v5, %s1292_s4 }
 0xdbc   :  { %v501_v7 = vpop.permute.xlu2 %500 }
 0xdbd   :  { %1131 = vmatmul.msk.bf16.vlgmr.msra.gmra.mxu0 %vm122_vm6, %v501_v7 }
 0xe3a   :  { %v514_v9 = vpop.f32.mrf.mxu0 }
 0xe3b   :  { %v519_v10 = vrot.slane %v514_v9, 4  ;;  %v1468_v9 = vld [vmem:[%s1554_s7] ss:$0 sm:$0xff] }
 0xe3d   :  { %v521_v11 = vadd.f32 %v519_v10, %v1433_v12  ;;  %v1472_v10 = vadd.f32 %v1468_v9, %v1421_v42 }
 0xe3f   :  { %1226 = vtanh.f32 %v521_v11  ;;  %v1132_v15 = vmul.f32 -1.442695, %v521_v11 }
 0xe41   :  { %1228 = vpow2.f32 %v1132_v15 }
 0xe42   :  { %v516_v13 = vpop.f32.mrf.mxu0 }
 0xe45   :  { %v1227_v14 = vpop.eup %1226 }
 0xe46   :  { %547 = vrot.lane.b32.xlu0 %v1227_v14, %s1291_s3 }
 0xe47   :  { %v1229_v16 = vpop.eup %1228 }
 0xe48   :  { %v525_v17 = vadd.f32 1.0, %v1229_v16 }
 0xe4a   :  { %1230 = vrcp.f32 %v525_v17  ;;  %v537_v23 = vand.u32 2147483648, %v525_v17  ;;  %vm531_vm14 = vweird.f32 %v525_v17  ;;  %v535_v24 = vand.u32 2147483647, %v525_v17 }
 0xe4c   :  { %v538_v3 = vor.u32 1.1754944e-38, %v537_v23  ;;  %vm536_vm0 = vcmp.eq.f32.partialorder %v535_v24, 8.507059e+37 }
 0xe50   :  { %v1231_v18 = vpop.eup %1230 }
 0xe51   :  { %v527_v19 = vmul.f32 %v1231_v18, %v525_v17  ;;  %vm532_vm13 = vweird.f32 %v1231_v18 }
 0xe52   :  { %vm533_vm15 = vmor %vm531_vm14, %vm532_vm13 }
 0xe53   :  { %v528_v20 = vsub.f32 1.0, %v527_v19 }
 0xe55   :  { %v529_v21 = vmul.f32 %v1231_v18, %v528_v20 }
 0xe57   :  { %v530_v22 = vadd.f32 %v1231_v18, %v529_v21 }
 0xe59   :  { %v534_v6 = vsel %vm533_vm15, %v1231_v18, %v530_v22 }
 0xe5a   :  { %v539_v26 = vsel %vm536_vm0, %v538_v3, %v534_v6 }
 0xe5b   :  { %v545_v29 = vmul.f32 %v543_v28, %v539_v26 }
 0xeb8   :  { %v548_v25 = vpop.permute.xlu0 %547 }
 0xeb9   :  { %v550_v27 = vmul.f32 %v548_v25, %v539_v26 }
 0xebb   :  { %552 = vrot.lane.b32.xlu1 %v550_v27, %s1291_s3 }
 0xf2d   :  { %v553_v30 = vpop.permute.xlu1 %552 }
 0xf2e   :  { %v555_v31 = vadd.f32 %v553_v30, %v545_v29 }
 0xf30   :  { %1232 = vtanh.f32 %v555_v31  ;;  %v608_v8 = vrot.slane %v555_v31, 6 }
 0xf36   :  { %v1233_v32 = vpop.eup %1232 }
 0xf37   :  { %558 = vrot.lane.b32.xlu2 %v1233_v32, %s1291_s3 }
 0xf91   :  { %v559_v33 = vpop.permute.xlu2 %558 }
 0xf92   :  { %v561_v34 = vmul.f32 %v559_v33, %v539_v26 }
 0xf94   :  { %v562_v35 = vpack.c.bf16 %v561_v34, %v561_v34 }
 0xf96   :  { %v564_v36 = vrot.slane %v562_v35, 2 }
 0xf98   :  { %565 = vrot.lane.b32.xlu0 %v564_v36, %s1292_s4 }
0x100a   :  { %v566_v37 = vpop.permute.xlu0 %565 }
0x100b   :  { %1133 = vmatmul.msk.bf16.vlgmr.msra.gmra.mxu1 %vm122_vm6, %v566_v37 }
0x1088   :  { %v579_v38 = vpop.f32.mrf.mxu1 }
0x1089   :  { %v584_v39 = vrot.slane %v579_v38, 2 }
0x108b   :  { %v586_v40 = vadd.f32 %v584_v39, %v1433_v12 }
0x108d   :  { %1234 = vtanh.f32 %v586_v40  ;;  %v1134_v45 = vmul.f32 -1.442695, %v586_v40 }
0x108f   :  { %1236 = vpow2.f32 %v1134_v45 }
0x1090   :  { %v581_v41 = vpop.f32.mrf.mxu1 }
0x1093   :  { %v1235_v44 = vpop.eup %1234 }
0x1094   :  { %612 = vrot.lane.b32.xlu1 %v1235_v44, %s1291_s3 }
0x1095   :  { %v1237_v46 = vpop.eup %1236 }
0x1096   :  { %v590_v1 = vadd.f32 1.0, %v1237_v46 }
0x1098   :  { %1238 = vrcp.f32 %v590_v1  ;;  %v602_v51 = vand.u32 2147483648, %v590_v1  ;;  %vm596_vm3 = vweird.f32 %v590_v1  ;;  %v600_v52 = vand.u32 2147483647, %v590_v1 }
0x109a   :  { %v603_v53 = vor.u32 1.1754944e-38, %v602_v51  ;;  %vm601_vm5 = vcmp.eq.f32.partialorder %v600_v52, 8.507059e+37 }
0x109e   :  { %v1239_v4 = vpop.eup %1238 }
0x109f   :  { %v592_v47 = vmul.f32 %v1239_v4, %v590_v1  ;;  %vm597_vm2 = vweird.f32 %v1239_v4 }
0x10a0   :  { %vm598_vm4 = vmor %vm596_vm3, %vm597_vm2 }
0x10a1   :  { %v593_v48 = vsub.f32 1.0, %v592_v47 }
0x10a3   :  { %v594_v49 = vmul.f32 %v1239_v4, %v593_v48 }
0x10a5   :  { %v595_v50 = vadd.f32 %v1239_v4, %v594_v49 }
0x10a7   :  { %v599_v12 = vsel %vm598_vm4, %v1239_v4, %v595_v50 }
0x10a8   :  { %v604_v55 = vsel %vm601_vm5, %v603_v53, %v599_v12 }
0x10a9   :  { %v610_v57 = vmul.f32 %v608_v8, %v604_v55 }
0x1106   :  { %v613_v54 = vpop.permute.xlu1 %612 }
0x1107   :  { %v615_v56 = vmul.f32 %v613_v54, %v604_v55 }
0x1109   :  { %617 = vrot.lane.b32.xlu2 %v615_v56, %s1291_s3 }
0x1163   :  { %v618_v58 = vpop.permute.xlu2 %617 }
0x1164   :  { %v620_v59 = vadd.f32 %v618_v58, %v610_v57 }
0x1166   :  { %1240 = vtanh.f32 %v620_v59  ;;  %v682_v28 = vrot.slane %v620_v59, 6 }
0x116c   :  { %v1241_v60 = vpop.eup %1240 }
0x116d   :  { %623 = vrot.lane.b32.xlu0 %v1241_v60, %s1291_s3 }
0x11df   :  { %v624_v63 = vpop.permute.xlu0 %623 }
0x11e0   :  { %v626_v0 = vmul.f32 %v624_v63, %v604_v55 }
0x11e2   :  { %v627_v2 = vpack.c.bf16 %v626_v0, %v626_v0 }
0x11e4   :  { %v629_v5 = vrot.slane %v627_v2, 3 }
0x11e6   :  { %630 = vrot.lane.b32.xlu1 %v629_v5, %s1292_s4 }
0x1258   :  { %v631_v7 = vpop.permute.xlu1 %630 }
0x1259   :  { %1143 = vmatmul.msk.bf16.vlgmr.msra.gmra.mxu2 %vm122_vm6, %v631_v7 }
0x12dc   :  { %v656_v11 = vpop.f32.mrf.mxu2 }
0x12dd   :  { %v660_v13 = vadd.f32 %v656_v11, %v1472_v10 }
0x12df   :  { %1242 = vtanh.f32 %v660_v13  ;;  %v1144_v16 = vmul.f32 -1.442695, %v660_v13 }
0x12e1   :  { %1244 = vpow2.f32 %v1144_v16 }
0x12e4   :  { %v658_v14 = vpop.f32.mrf.mxu2 }
0x12e5   :  { %v1243_v15 = vpop.eup %1242 }
0x12e6   :  { %686 = vrot.lane.b32.xlu2 %v1243_v15, %s1291_s3 }
0x12e7   :  { %v1245_v17 = vpop.eup %1244 }
0x12e8   :  { %v664_v18 = vadd.f32 1.0, %v1245_v17 }
0x12ea   :  { %1246 = vrcp.f32 %v664_v18  ;;  %v676_v42 = vand.u32 2147483648, %v664_v18  ;;  %vm670_vm8 = vweird.f32 %v664_v18  ;;  %v674_v24 = vand.u32 2147483647, %v664_v18 }
0x12ec   :  { %v677_v3 = vor.u32 1.1754944e-38, %v676_v42  ;;  %vm675_vm10 = vcmp.eq.f32.partialorder %v674_v24, 8.507059e+37 }
0x12f0   :  { %v1247_v19 = vpop.eup %1246 }
0x12f1   :  { %v666_v20 = vmul.f32 %v1247_v19, %v664_v18  ;;  %vm671_vm7 = vweird.f32 %v1247_v19 }
0x12f2   :  { %vm672_vm9 = vmor %vm670_vm8, %vm671_vm7 }
0x12f3   :  { %v667_v21 = vsub.f32 1.0, %v666_v20 }
0x12f5   :  { %v668_v22 = vmul.f32 %v1247_v19, %v667_v21 }
0x12f7   :  { %v669_v23 = vadd.f32 %v1247_v19, %v668_v22 }
0x12f9   :  { %v673_v6 = vsel %vm672_vm9, %v1247_v19, %v669_v23 }
0x12fa   :  { %v678_v26 = vsel %vm675_vm10, %v677_v3, %v673_v6 }
0x12fb   :  { %v684_v29 = vmul.f32 %v682_v28, %v678_v26 }
0x1340   :  { %v687_v25 = vpop.permute.xlu2 %686 }
0x1341   :  { %v689_v27 = vmul.f32 %v687_v25, %v678_v26 }
0x1343   :  { %691 = vrot.lane.b32.xlu0 %v689_v27, %s1291_s3 }
0x13b5   :  { %v692_v30 = vpop.permute.xlu0 %691 }
0x13b6   :  { %v694_v31 = vadd.f32 %v692_v30, %v684_v29 }
0x13b8   :  { %1248 = vtanh.f32 %v694_v31  ;;  %v752_v56 = vrot.slane %v694_v31, 6 }
0x13be   :  { %v1249_v32 = vpop.eup %1248 }
0x13bf   :  { %697 = vrot.lane.b32.xlu1 %v1249_v32, %s1291_s3 }
0x1431   :  { %v698_v33 = vpop.permute.xlu1 %697 }
0x1432   :  { %v1478_v34 = vmul.f32 %v698_v33, %v678_v26 }
0x1434   :  { %v707_v35 = vpack.c.bf16 %v1478_v34, %v1478_v34 }
0x1436   :  { %709 = vrot.lane.b32.xlu2 %v707_v35, %s1292_s4 }
0x1490   :  { %v710_v36 = vpop.permute.xlu2 %709 }
0x1491   :  { %1145 = vmatmul.msk.bf16.vlgmr.msra.gmra.mxu3 %vm122_vm6, %v710_v36 }
0x1514   :  { %v723_v37 = vpop.f32.mrf.mxu3 }
0x1515   :  { %v728_v38 = vrot.slane %v723_v37, 6 }
0x1517   :  { %v730_v39 = vadd.f32 %v728_v38, %v1472_v10 }
0x1519   :  { %1250 = vtanh.f32 %v730_v39  ;;  %v1146_v44 = vmul.f32 -1.442695, %v730_v39 }
0x151b   :  { %1252 = vpow2.f32 %v1146_v44 }
0x151c   :  { %v725_v40 = vpop.f32.mrf.mxu3 }
0x151f   :  { %v1251_v41 = vpop.eup %1250 }
0x1520   :  { %756 = vrot.lane.b32.xlu0 %v1251_v41, %s1291_s3 }
0x1521   :  { %v1253_v45 = vpop.eup %1252 }
0x1522   :  { %v734_v46 = vadd.f32 1.0, %v1253_v45 }
0x1524   :  { %1254 = vrcp.f32 %v734_v46  ;;  %v746_v50 = vand.u32 2147483648, %v734_v46  ;;  %vm740_vm12 = vweird.f32 %v734_v46  ;;  %v744_v51 = vand.u32 2147483647, %v734_v46 }
0x1526   :  { %v747_v12 = vor.u32 1.1754944e-38, %v746_v50  ;;  %vm745_vm14 = vcmp.eq.f32.partialorder %v744_v51, 8.507059e+37 }
0x152a   :  { %v1255_v1 = vpop.eup %1254 }
0x152b   :  { %v736_v4 = vmul.f32 %v1255_v1, %v734_v46  ;;  %vm741_vm11 = vweird.f32 %v1255_v1 }
0x152c   :  { %vm742_vm13 = vmor %vm740_vm12, %vm741_vm11 }
0x152d   :  { %v737_v47 = vsub.f32 1.0, %v736_v4 }
0x152f   :  { %v738_v48 = vmul.f32 %v1255_v1, %v737_v47 }
0x1531   :  { %v739_v49 = vadd.f32 %v1255_v1, %v738_v48 }
0x1533   :  { %v743_v52 = vsel %vm742_vm13, %v1255_v1, %v739_v49 }
0x1534   :  { %v748_v54 = vsel %vm745_vm14, %v747_v12, %v743_v52 }
0x1535   :  { %v754_v8 = vmul.f32 %v752_v56, %v748_v54 }
0x1592   :  { %v757_v53 = vpop.permute.xlu0 %756 }
0x1593   :  { %v759_v55 = vmul.f32 %v757_v53, %v748_v54 }
0x1595   :  { %761 = vrot.lane.b32.xlu1 %v759_v55, %s1291_s3 }
0x1607   :  { %v762_v57 = vpop.permute.xlu1 %761 }
0x1608   :  { %v764_v58 = vadd.f32 %v762_v57, %v754_v8 }
0x160a   :  { %1256 = vtanh.f32 %v764_v58  ;;  %v823_v26 = vrot.slane %v764_v58, 6 }
0x1610   :  { %v1257_v59 = vpop.eup %1256 }
0x1611   :  { %767 = vrot.lane.b32.xlu2 %v1257_v59, %s1291_s3 }
0x166b   :  { %v768_v60 = vpop.permute.xlu2 %767 }
0x166c   :  { %v1488_v61 = vmul.f32 %v768_v60, %v748_v54 }
0x166e   :  { %v777_v62 = vpack.c.bf16 %v1488_v61, %v1488_v61 }
0x1670   :  { %v779_v63 = vrot.slane %v777_v62, 1 }
0x1672   :  { %780 = vrot.lane.b32.xlu0 %v779_v63, %s1292_s4 }
0x16e4   :  { %v781_v0 = vpop.permute.xlu0 %780 }
0x16e5   :  { %1147 = vmatmul.msk.bf16.vlgmr.msrb.gmra.mxu0 %vm122_vm6, %v781_v0 }
0x1762   :  { %v794_v2 = vpop.f32.mrf.mxu0 }
0x1763   :  { %v799_v5 = vrot.slane %v794_v2, 4  ;;  %v100_v2 = vadd.f32 %v1468_v9, %v1423_v43 }
0x1765   :  { %v801_v7 = vadd.f32 %v799_v5, %v1472_v10 }
0x1767   :  { %1258 = vtanh.f32 %v801_v7  ;;  %v1148_v14 = vmul.f32 -1.442695, %v801_v7 }
0x1769   :  { %1260 = vpow2.f32 %v1148_v14 }
0x176a   :  { %v796_v11 = vpop.f32.mrf.mxu0 }
0x176d   :  { %v1259_v13 = vpop.eup %1258 }
0x176e   :  { %827 = vrot.lane.b32.xlu1 %v1259_v13, %s1291_s3 }
0x176f   :  { %v1261_v15 = vpop.eup %1260 }
0x1770   :  { %v805_v16 = vadd.f32 1.0, %v1261_v15 }
0x1772   :  { %1262 = vrcp.f32 %v805_v16  ;;  %v817_v22 = vand.u32 2147483648, %v805_v16  ;;  %vm811_vm0 = vweird.f32 %v805_v16  ;;  %v815_v23 = vand.u32 2147483647, %v805_v16 }
0x1774   :  { %v818_v24 = vor.u32 1.1754944e-38, %v817_v22  ;;  %vm816_vm3 = vcmp.eq.f32.partialorder %v815_v23, 8.507059e+37 }
0x1778   :  { %v1263_v17 = vpop.eup %1262 }
0x1779   :  { %v807_v18 = vmul.f32 %v1263_v17, %v805_v16  ;;  %vm812_vm15 = vweird.f32 %v1263_v17 }
0x177a   :  { %vm813_vm2 = vmor %vm811_vm0, %vm812_vm15 }
0x177b   :  { %v808_v19 = vsub.f32 1.0, %v807_v18 }
0x177d   :  { %v809_v20 = vmul.f32 %v1263_v17, %v808_v19 }
0x177f   :  { %v810_v21 = vadd.f32 %v1263_v17, %v809_v20 }
0x1781   :  { %v814_v42 = vsel %vm813_vm2, %v1263_v17, %v810_v21  ;;  %vm705_vm2 = vcmask 254976  }
0x1782   :  { %v819_v3 = vsel %vm816_vm3, %v818_v24, %v814_v42  ;;  %vm917_vm3 = vcmask 261126  }
0x1783   :  { %v825_v27 = vmul.f32 %v823_v26, %v819_v3 }
0x17e0   :  { %v828_v6 = vpop.permute.xlu1 %827 }
0x17e1   :  { %v830_v25 = vmul.f32 %v828_v6, %v819_v3 }
0x17e3   :  { %832 = vrot.lane.b32.xlu2 %v830_v25, %s1291_s3 }
0x183d   :  { %v833_v28 = vpop.permute.xlu2 %832 }
0x183e   :  { %v835_v29 = vadd.f32 %v833_v28, %v825_v27 }
0x1840   :  { %1264 = vtanh.f32 %v835_v29  ;;  %v894_v55 = vrot.slane %v835_v29, 6 }
0x1846   :  { %v1265_v30 = vpop.eup %1264 }
0x1847   :  { %838 = vrot.lane.b32.xlu0 %v1265_v30, %s1291_s3 }
0x18b9   :  { %v839_v31 = vpop.permute.xlu0 %838 }
0x18ba   :  { %v1498_v32 = vmul.f32 %v839_v31, %v819_v3 }
0x18bc   :  { %v848_v33 = vpack.c.bf16 %v1498_v32, %v1498_v32 }
0x18be   :  { %v850_v35 = vrot.slane %v848_v33, 2 }
0x18c0   :  { %851 = vrot.lane.b32.xlu1 %v850_v35, %s1292_s4 }
0x1932   :  { %v852_v36 = vpop.permute.xlu1 %851 }
0x1933   :  { %1149 = vmatmul.msk.bf16.vlgmr.msrb.gmra.mxu1 %vm122_vm6, %v852_v36 }
0x19b0   :  { %v865_v37 = vpop.f32.mrf.mxu1 }
0x19b1   :  { %v870_v38 = vrot.slane %v865_v37, 2 }
0x19b3   :  { %v872_v39 = vadd.f32 %v870_v38, %v1472_v10 }
0x19b5   :  { %1266 = vtanh.f32 %v872_v39  ;;  %v1150_v44 = vmul.f32 -1.442695, %v872_v39 }
0x19b7   :  { %1268 = vpow2.f32 %v1150_v44 }
0x19b8   :  { %v867_v40 = vpop.f32.mrf.mxu1 }
0x19bb   :  { %v1267_v41 = vpop.eup %1266 }
0x19bc   :  { %898 = vrot.lane.b32.xlu2 %v1267_v41, %s1291_s3 }
0x19bd   :  { %v1269_v45 = vpop.eup %1268 }
0x19be   :  { %v876_v46 = vadd.f32 1.0, %v1269_v45 }
0x19c0   :  { %1270 = vrcp.f32 %v876_v46  ;;  %v888_v50 = vand.u32 2147483648, %v876_v46  ;;  %vm882_vm5 = vweird.f32 %v876_v46  ;;  %v886_v51 = vand.u32 2147483647, %v876_v46 }
0x19c2   :  { %v889_v52 = vor.u32 1.1754944e-38, %v888_v50  ;;  %vm887_vm8 = vcmp.eq.f32.partialorder %v886_v51, 8.507059e+37 }
0x19c6   :  { %v1271_v1 = vpop.eup %1270 }
0x19c7   :  { %v878_v4 = vmul.f32 %v1271_v1, %v876_v46  ;;  %vm883_vm4 = vweird.f32 %v1271_v1 }
0x19c8   :  { %vm884_vm7 = vmor %vm882_vm5, %vm883_vm4  ;;  %vm775_vm4 = vcmask 257026   ;;  %vm846_vm5 = vcmask 259076  }
0x19c9   :  { %v879_v47 = vsub.f32 1.0, %v878_v4 }
0x19cb   :  { %v880_v48 = vmul.f32 %v1271_v1, %v879_v47 }
0x19cd   :  { %v881_v49 = vadd.f32 %v1271_v1, %v880_v48 }
0x19cf   :  { %v885_v10 = vsel %vm884_vm7, %v1271_v1, %v881_v49  ;;  %vm1096_vm7 = vcmask 27648  }
0x19d0   :  { %v890_v53 = vsel %vm887_vm8, %v889_v52, %v885_v10 }
0x19d1   :  { %v896_v56 = vmul.f32 %v894_v55, %v890_v53 }
0x1a16   :  { %v899_v12 = vpop.permute.xlu2 %898 }
0x1a17   :  { %v901_v54 = vmul.f32 %v899_v12, %v890_v53 }
0x1a19   :  { %903 = vrot.lane.b32.xlu0 %v901_v54, %s1291_s3 }
0x1a8b   :  { %v904_v8 = vpop.permute.xlu0 %903 }
0x1a8c   :  { %v906_v57 = vadd.f32 %v904_v8, %v896_v56 }
0x1a8e   :  { %1272 = vtanh.f32 %v906_v57  ;;  %v962_v3 = vrot.slane %v906_v57, 6 }
0x1a94   :  { %v1273_v58 = vpop.eup %1272 }
0x1a95   :  { %909 = vrot.lane.b32.xlu1 %v1273_v58, %s1291_s3 }
0x1b07   :  { %v910_v59 = vpop.permute.xlu1 %909 }
0x1b08   :  { %v912_v60 = vmul.f32 %v910_v59, %v890_v53 }
0x1b0a   :  { %v919_v62 = vpack.c.bf16 %v912_v60, %v912_v60 }
0x1b0c   :  { %v921_v63 = vrot.slane %v919_v62, 3 }
0x1b0e   :  { %922 = vrot.lane.b32.xlu2 %v921_v63, %s1292_s4 }
0x1b68   :  { %v923_v0 = vpop.permute.xlu2 %922 }
0x1b69   :  { %1151 = vmatmul.msk.bf16.vlgmr.msrb.gmra.mxu2 %vm122_vm6, %v923_v0  ;;  %v1170_v0 = vld [vmem:[%s1558_s8] sm:$0xff] }
0x1bec   :  { %v936_v5 = vpop.f32.mrf.mxu2 }
0x1bed   :  { %v940_v7 = vadd.f32 %v936_v5, %v100_v2 }
0x1bef   :  { %1274 = vtanh.f32 %v940_v7  ;;  %v1152_v14 = vmul.f32 -1.442695, %v940_v7 }
0x1bf1   :  { %1276 = vpow2.f32 %v1152_v14 }
0x1bf4   :  { %v938_v11 = vpop.f32.mrf.mxu2 }
0x1bf5   :  { %v1275_v13 = vpop.eup %1274  ;;  %v1177_v11 = vld [vmem:[%s1559_s9] ss:$0 sm:$0xff] }
0x1bf6   :  { %966 = vrot.lane.b32.xlu0 %v1275_v13, %s1291_s3 }
0x1bf7   :  { %v1277_v15 = vpop.eup %1276 }
0x1bf8   :  { %v944_v16 = vadd.f32 1.0, %v1277_v15 }
0x1bfa   :  { %1278 = vrcp.f32 %v944_v16  ;;  %v956_v22 = vand.u32 2147483648, %v944_v16  ;;  %vm950_vm10 = vweird.f32 %v944_v16  ;;  %v954_v43 = vand.u32 2147483647, %v944_v16 }
0x1bfc   :  { %v957_v23 = vor.u32 1.1754944e-38, %v956_v22  ;;  %vm955_vm12 = vcmp.eq.f32.partialorder %v954_v43, 8.507059e+37 }
0x1c00   :  { %v1279_v17 = vpop.eup %1278 }
0x1c01   :  { %v946_v18 = vmul.f32 %v1279_v17, %v944_v16  ;;  %vm951_vm9 = vweird.f32 %v1279_v17 }
0x1c02   :  { %vm952_vm11 = vmor %vm950_vm10, %vm951_vm9 }
0x1c03   :  { %v947_v19 = vsub.f32 1.0, %v946_v18 }
0x1c05   :  { %v948_v20 = vmul.f32 %v1279_v17, %v947_v19 }
0x1c07   :  { %v949_v21 = vadd.f32 %v1279_v17, %v948_v20 }
0x1c09   :  { %v953_v9 = vsel %vm952_vm11, %v1279_v17, %v949_v21 }
0x1c0a   :  { %v958_v24 = vsel %vm955_vm12, %v957_v23, %v953_v9 }
0x1c0b   :  { %v964_v25 = vmul.f32 %v962_v3, %v958_v24 }
0x1c68   :  { %v967_v42 = vpop.permute.xlu0 %966 }
0x1c69   :  { %v969_v6 = vmul.f32 %v967_v42, %v958_v24 }
0x1c6b   :  { %971 = vrot.lane.b32.xlu1 %v969_v6, %s1291_s3 }
0x1cdd   :  { %v972_v26 = vpop.permute.xlu1 %971 }
0x1cde   :  { %v974_v27 = vadd.f32 %v972_v26, %v964_v25 }
0x1ce0   :  { %1280 = vtanh.f32 %v974_v27  ;;  %v1031_v54 = vrot.slane %v974_v27, 6 }
0x1ce6   :  { %v1281_v28 = vpop.eup %1280 }
0x1ce7   :  { %977 = vrot.lane.b32.xlu2 %v1281_v28, %s1291_s3 }
0x1d41   :  { %v978_v29 = vpop.permute.xlu2 %977 }
0x1d42   :  { %v980_v30 = vmul.f32 %v978_v29, %v958_v24 }
0x1d44   :  { %v986_v31 = vpack.c.bf16 %v980_v30, %v980_v30 }
0x1d46   :  { %988 = vrot.lane.b32.xlu0 %v986_v31, %s1292_s4 }
0x1db8   :  { %v989_v33 = vpop.permute.xlu0 %988 }
0x1db9   :  { %1153 = vmatmul.msk.bf16.vlgmr.msrb.gmra.mxu3 %vm122_vm6, %v989_v33 }
0x1e3c   :  { %v1002_v35 = vpop.f32.mrf.mxu3 }
0x1e3d   :  { %v1007_v36 = vrot.slane %v1002_v35, 6 }
0x1e3f   :  { %v1009_v37 = vadd.f32 %v1007_v36, %v100_v2 }
0x1e41   :  { %1282 = vtanh.f32 %v1009_v37  ;;  %v1154_v40 = vmul.f32 -1.442695, %v1009_v37 }
0x1e43   :  { %1284 = vpow2.f32 %v1154_v40 }
0x1e44   :  { %v1004_v38 = vpop.f32.mrf.mxu3 }
0x1e47   :  { %v1283_v39 = vpop.eup %1282 }
0x1e48   :  { %1035 = vrot.lane.b32.xlu1 %v1283_v39, %s1291_s3 }
0x1e49   :  { %v1285_v41 = vpop.eup %1284 }
0x1e4a   :  { %v1013_v44 = vadd.f32 1.0, %v1285_v41 }
0x1e4c   :  { %1286 = vrcp.f32 %v1013_v44  ;;  %v1025_v48 = vand.u32 2147483648, %v1013_v44  ;;  %vm1019_vm14 = vweird.f32 %v1013_v44  ;;  %v1023_v49 = vand.u32 2147483647, %v1013_v44 }
0x1e4e   :  { %v1026_v51 = vor.u32 1.1754944e-38, %v1025_v48  ;;  %vm1024_vm0 = vcmp.eq.f32.partialorder %v1023_v49, 8.507059e+37 }
0x1e50   :  { %702 = vrot.lane.b32.xlu1 %v1478_v34, %s1292_s4 }
0x1e52   :  { %v1287_v45 = vpop.eup %1286 }
0x1e53   :  { %v1015_v46 = vmul.f32 %v1287_v45, %v1013_v44  ;;  %vm1020_vm13 = vweird.f32 %v1287_v45 }
0x1e54   :  { %vm1021_vm15 = vmor %vm1019_vm14, %vm1020_vm13 }
0x1e55   :  { %v1016_v1 = vsub.f32 1.0, %v1015_v46 }
0x1e57   :  { %v1017_v4 = vmul.f32 %v1287_v45, %v1016_v1 }
0x1e58   :  { %914 = vrot.lane.b32.xlu1 %v912_v60, %s1292_s4 }
0x1e59   :  { %v1018_v47 = vadd.f32 %v1287_v45, %v1017_v4 }
0x1e5b   :  { %v1022_v50 = vsel %vm1021_vm15, %v1287_v45, %v1018_v47 }
0x1e5c   :  { %v1027_v10 = vsel %vm1024_vm0, %v1026_v51, %v1022_v50 }
0x1e5d   :  { %v1033_v55 = vmul.f32 %v1031_v54, %v1027_v10 }
0x1eba   :  { %v1036_v34 = vpop.permute.xlu1 %1035 }
0x1ebb   :  { %v1038_v52 = vmul.f32 %v1036_v34, %v1027_v10 }
0x1ebd   :  { %1040 = vrot.lane.b32.xlu2 %v1038_v52, %s1291_s3 }
0x1ec2   :  { %v703_v12 = vpop.permute.xlu1 %702 }
0x1ec3   :  { %706 = vst.msk [vmem:[#allocation2] sm:$0x3] %vm705_vm2, %v703_v12 }
0x1ec5   :  { %772 = vrot.lane.b32.xlu2 %v1488_v61, %s1292_s4  ;;  %v1171_v61 = vld [vmem:[%s1558_s8 + $0x8] sm:$0xff] }
0x1ec6   :  { %1087 = vmatpush.bf16.msra.mxu0 %v1171_v61 }
0x1eca   :  { %v915_v53 = vpop.permute.xlu1 %914  ;;  %1088 = vmatpush.bf16.msra.mxu0 %v1170_v0 }
0x1ecb   :  { %918 = vst.msk [vmem:[#allocation2] sm:$0xc0] %vm917_vm3, %v915_v53 }
0x1ecd   :  { %982 = vrot.lane.b32.xlu2 %v980_v30, %s1292_s4 }
0x1f17   :  { %v1041_v56 = vpop.permute.xlu2 %1040 }
0x1f18   :  { %v1043_v8 = vadd.f32 %v1041_v56, %v1033_v55 }
0x1f1a   :  { %1288 = vtanh.f32 %v1043_v8 }
0x1f1f   :  { %v773_v57 = vpop.permute.xlu2 %772 }
0x1f20   :  { %v1289_v58 = vpop.eup %1288  ;;  %776 = vst.msk [vmem:[#allocation2] sm:$0xc] %vm775_vm4, %v773_v57 }
0x1f21   :  { %1046 = vrot.lane.b32.xlu0 %v1289_v58, %s1291_s3 }
0x1f27   :  { %v983_v59 = vpop.permute.xlu2 %982 }
0x1f28   :  { %985 = vst.msk [vmem:[#allocation2 + $0x8] sm:$0x3] %vm705_vm2, %v983_v59 }
0x1f29   :  { %843 = vrot.lane.b32.xlu0 %v1498_v32, %s1292_s4 }
0x1f93   :  { %v1047_v60 = vpop.permute.xlu0 %1046 }
0x1f94   :  { %v1049_v62 = vmul.f32 %v1047_v60, %v1027_v10 }
0x1f96   :  { %1051 = vrot.lane.b32.xlu0 %v1049_v62, %s1292_s4 }
0x1f9b   :  { %v844_v63 = vpop.permute.xlu0 %843 }
0x1f9c   :  { %847 = vst.msk [vmem:[#allocation2] sm:$0x30] %vm846_vm5, %v844_v63 }
0x1fa3   :  { %v1055_v32 = vld [vmem:[#allocation2] sm:$0xff] }
0x2008   :  { %v1052_v2 = vpop.permute.xlu0 %1051 }
0x2009   :  { %1054 = vst.msk [vmem:[#allocation2 + $0x8] sm:$0xc] %vm775_vm4, %v1052_v2 }
0x2010   :  { %v1056_v5 = vld [vmem:[#allocation2 + $0x8] sm:$0xf] }
0x2011   :  { %v1057_v7 = vpack.c.bf16 %v1056_v5, %v1055_v32 }
0x2013   :  { %1163 = vmatmul.msk.bf16.vlgmr.msra.gmra.mxu0 %vm122_vm6, %v1057_v7 }
0x2090   :  { %v1090_v13 = vpop.f32.mrf.mxu0 }
0x2091   :  { %v1091_v14 = vadd.f32 %v1177_v11, %v1090_v13 }
0x2093   :  { %1095 = vst.msk [vmem:[%s1560_s10] sm:$0xff] %vm48_vm1, %v1091_v14 }
0x2098   :  { %v1092_v15 = vpop.f32.mrf.mxu0 }
0x2099   :  { %v1093_v16 = vadd.f32 %v1177_v11, %v1092_v15 }
0x209b   :  { %1097 = vst.msk [vmem:[%s1560_s10 + $0x8] sm:$0xf] %vm1096_vm7, %v1093_v16 }

</bundles_post_ra>
